<compile_context>
chip_gen: v5e
topology: v5e:2x2
jax: 0.10.0
libtpu: 0.0.40
codegen_flags: <defaults>
</compile_context>

<pallas_src>
import jax
import jax.numpy as jnp
from jax.experimental import pallas as pl
from jax.experimental.pallas import tpu as pltpu

KSIZE = 7
PAD = KSIZE // 2
_LANE = 128


# ---------------------------------------------------------------------------
# VMEM budget / tile helpers (generation + dtype aware)
# ---------------------------------------------------------------------------
def _vmem_capacity():
    try:
        return int(pltpu.get_tpu_info().vmem_capacity_bytes)
    except Exception:
        return 128 * 1024 * 1024


def _sublane_quantum(dtype):
    # packed sublane granularity: f32 -> 8, bf16 -> 16, int8/fp8 -> 32
    return {4: 8, 2: 16, 1: 32}.get(jnp.dtype(dtype).itemsize, 8)


def _stream_budget(vmem_cap):
    # v7x has only 64 MiB physical VMEM -> smaller per-block budget.
    return 5 * 1024 * 1024 if vmem_cap <= 80 * 1024 * 1024 else 10 * 1024 * 1024


def _vmem_limit(est_bytes, vmem_cap):
    lim = max(16 * 1024 * 1024, int(est_bytes * 1.3) + (1 << 20))
    return int(min(lim, int(vmem_cap * 0.9)))


def _stream_tiles(C, HW, elem_bytes, budget, quantum):
    """(channel_tile, spatial_tile) for the streaming (pool / apply) passes."""
    if C * HW * elem_bytes <= budget:
        return C, HW
    rows = budget // (HW * elem_bytes)
    if rows >= quantum:
        return min(C, (rows // quantum) * quantum), HW
    tc = min(C, quantum)
    lanes = max(1, budget // (tc * elem_bytes * _LANE))
    return tc, min(HW, lanes * _LANE)


def _fused_vmem_estimate(C, HW, eb):
    est = 4 * C * HW * eb + 2 * (2 * KSIZE) * HW * 4 + 32 * HW * 4
    if eb < 4:
        est += C * HW * 4        # possible f32 upcast of the tile for the sum
    return est


# ---------------------------------------------------------------------------
# Lane-dense flat 7x7 conv helper (shared by the fused and conv kernels)
# ---------------------------------------------------------------------------
def _shift_flat(x, d, n):
    """y[:, q] = x[:, (q + d) % n] for a static shift d (wrap; caller masks)."""
    d = d % n
    if d == 0:
        return x
    return jnp.concatenate([x[:, d:], x[:, :d]], axis=1)


def _conv7x7_flat(sum_map, max_map, w_ref, m_ref, H, W):
    """7x7 conv (2 -> 1 ch, zero padding 3) on lane-dense flat (1, H*W) maps.

    w_ref: SMEM (98,) f32 [avg-channel taps pre-scaled by 1/C, max-channel taps]
    m_ref: VMEM (14, H*W) f32 validity masks (rows 0..6 column masks per dj,
           rows 7..13 row masks per di).  Column shifts are hoisted over the
           row taps so only 2*7 + 7 lane shifts are issued per call.
    """
    HW = H * W
    A, M = [], []
    for dj in range(KSIZE):
        cm = m_ref[dj:dj + 1, :]
        A.append(cm * _shift_flat(sum_map, dj - PAD, HW))
        M.append(cm * _shift_flat(max_map, dj - PAD, HW))
    acc = jnp.zeros((1, HW), jnp.float32)
    for di in range(KSIZE):
        t = jnp.zeros((1, HW), jnp.float32)
        for dj in range(KSIZE):
            wa = w_ref[di * KSIZE + dj]
            wm = w_ref[KSIZE * KSIZE + di * KSIZE + dj]
            t = t + (wa * A[dj] + wm * M[dj])
        rm = m_ref[KSIZE + di:KSIZE + di + 1, :]
        acc = acc + rm * _shift_flat(t, (di - PAD) * W, HW)
    return acc


# ---------------------------------------------------------------------------
# Kernels
# ---------------------------------------------------------------------------
def _make_fused_kernel(H, W):
    """Whole image resident: pooling + conv + sigmoid + multiply, x read once."""
    def kernel(w_ref, x_ref, m_ref, o_ref):
        xs = x_ref[0]                                              # (C, HW)
        s = jnp.sum(xs.astype(jnp.float32), axis=0, keepdims=True)   # sum (1/C in w)
        mx = jnp.max(xs, axis=0, keepdims=True).astype(jnp.float32)
        attn = jax.nn.sigmoid(_conv7x7_flat(s, mx, w_ref, m_ref, H, W))
        if xs.dtype != jnp.float32:
            attn = attn.astype(xs.dtype)      # native (bf16) multiply on v6e/v7x
        o_ref[0] = (xs * attn).astype(o_ref.dtype)
    return kernel


def _make_pool_kernel(C, tc):
    """Channel sum/max pooling; ragged tail channel tiles are masked."""
    ragged = (C % tc) != 0

    def kernel(x_ref, p_ref):
        c = pl.program_id(2)
        thw = p_ref.shape[2]
        x = x_ref[0].astype(jnp.float32)                           # (tc, thw)
        if ragged:
            ch = c * tc + jax.lax.broadcasted_iota(jnp.int32, (tc, 1), 0)
            valid = ch < C
            xs = jnp.where(valid, x, 0.0)
            xm = jnp.where(valid, x, -jnp.inf)
        else:
            xs, xm = x, x

        @pl.when(c == 0)
        def _init():
            p_ref[0, 0:1, :] = jnp.zeros((1, thw), jnp.float32)
            p_ref[0, 1:2, :] = jnp.full((1, thw), -jnp.inf, jnp.float32)

        p_ref[0, 0:1, :] = p_ref[0, 0:1, :] + jnp.sum(xs, axis=0, keepdims=True)
        p_ref[0, 1:2, :] = jnp.maximum(p_ref[0, 1:2, :],
                                       jnp.max(xm, axis=0, keepdims=True))
    return kernel


def _make_conv_kernel(H, W):
    """Tiny per-image kernel: conv7x7 + sigmoid on the pooled maps."""
    def kernel(w_ref, p_ref, m_ref, a_ref):
        s = p_ref[0, 0:1, :]
        mx = p_ref[0, 1:2, :]
        attn = jax.nn.sigmoid(_conv7x7_flat(s, mx, w_ref, m_ref, H, W))
        a_ref[0] = attn.astype(a_ref.dtype)
    return kernel


def _apply_kernel(x_ref, a_ref, o_ref):
    """Lane-dense x * attn."""
    x = x_ref[0]                               # (tc, thw)
    a = a_ref[0]                               # (1, thw)
    if a.dtype != x.dtype:
        a = a.astype(x.dtype)
    o_ref[0] = (x * a).astype(o_ref.dtype)


# ---------------------------------------------------------------------------
# Wrapper
# ---------------------------------------------------------------------------
def sam_forward(x, conv_weight, *, block_budget_bytes=None, allow_fused=True):
    """x: (N, C, H, W); conv_weight: (1, 2, 7, 7) (PyTorch OIHW, bias=False)."""
    N, C, H, W = x.shape
    HW = H * W
    eb = jnp.dtype(x.dtype).itemsize
    cap = _vmem_capacity()
    budget = block_budget_bytes if block_budget_bytes is not None else _stream_budget(cap)

    # Flatten conv weights (avg taps first), folding 1/C into the avg taps so
    # both paths can pool with a plain channel sum.
    w2 = conv_weight.reshape(2, KSIZE * KSIZE).astype(jnp.float32)
    w_flat = jnp.concatenate([w2[0] * jnp.float32(1.0 / C), w2[1]], axis=0)

    # Edge-validity masks for the flat lane-dense conv (zero padding = 3).
    pos = jnp.arange(HW, dtype=jnp.int32)
    col = pos % W
    row = pos // W
    cmask = jnp.stack([((col + dj - PAD >= 0) & (col + dj - PAD < W))
                       for dj in range(KSIZE)])
    rmask = jnp.stack([((row + di - PAD >= 0) & (row + di - PAD < H))
                       for di in range(KSIZE)])
    masks = jnp.concatenate([cmask, rmask], axis=0).astype(jnp.float32)  # (14, HW)

    x_flat = x.reshape(N, C, HW)

    # ----- Fused single-pass path: x read from HBM exactly once -----
    fused_est = _fused_vmem_estimate(C, HW, eb)
    if allow_fused and fused_est <= int(0.7 * cap):
        out_flat = pl.pallas_call(
            _make_fused_kernel(H, W),
            out_shape=jax.ShapeDtypeStruct((N, C, HW), x.dtype),
            grid=(N,),
            in_specs=[
                pl.BlockSpec(memory_space=pltpu.MemorySpace.SMEM),        # weights
                pl.BlockSpec((1, C, HW), lambda n: (n, 0, 0)),            # x image
                pl.BlockSpec((2 * KSIZE, HW), lambda n: (0, 0)),          # masks
            ],
            out_specs=pl.BlockSpec((1, C, HW), lambda n: (n, 0, 0)),
            compiler_params=pltpu.CompilerParams(
                dimension_semantics=("parallel",),
                vmem_limit_bytes=_vmem_limit(fused_est, cap)),
        )(w_flat, x_flat, masks)
        return out_flat.reshape(N, C, H, W)

    # ----- Tiled fallback: pool -> conv -> apply -----
    quantum = _sublane_quantum(x.dtype)
    tc, thw = _stream_tiles(C, HW, eb, budget, quantum)
    n_s, n_c = pl.cdiv(HW, thw), pl.cdiv(C, tc)
    attn_dtype = (x.dtype if jnp.dtype(x.dtype) == jnp.dtype(jnp.bfloat16)
                  else jnp.float32)

    # 1) channel pooling: spatial axis parallel, channel axis is the reduction.
    pooled = pl.pallas_call(
        _make_pool_kernel(C, tc),
        out_shape=jax.ShapeDtypeStruct((N, 2, HW), jnp.float32),
        grid=(N, n_s, n_c),
        in_specs=[pl.BlockSpec((1, tc, thw), lambda n, s, c: (n, c, s))],
        out_specs=pl.BlockSpec((1, 2, thw), lambda n, s, c: (n, 0, s)),
        compiler_params=pltpu.CompilerParams(
            dimension_semantics=("parallel", "parallel", "arbitrary"),
            vmem_limit_bytes=_vmem_limit(
                2 * tc * thw * eb + tc * thw * 4 + 4 * thw * 4, cap)),
    )(x_flat)

    # 2) tiny per-image conv + sigmoid on the pooled maps.
    attn = pl.pallas_call(
        _make_conv_kernel(H, W),
        out_shape=jax.ShapeDtypeStruct((N, 1, HW), attn_dtype),
        grid=(N,),
        in_specs=[
            pl.BlockSpec(memory_space=pltpu.MemorySpace.SMEM),
            pl.BlockSpec((1, 2, HW), lambda n: (n, 0, 0)),
            pl.BlockSpec((2 * KSIZE, HW), lambda n: (0, 0)),
        ],
        out_specs=pl.BlockSpec((1, 1, HW), lambda n: (n, 0, 0)),
        compiler_params=pltpu.CompilerParams(
            dimension_semantics=("parallel",),
            vmem_limit_bytes=_vmem_limit(
                2 * (2 + 2 * KSIZE + 1) * HW * 4 + 32 * HW * 4, cap)),
    )(w_flat, pooled, masks)

    # 3) apply: grid (n, spatial, channel) so the attn block stays resident
    #    across the fastest-varying channel axis.
    out_flat = pl.pallas_call(
        _apply_kernel,
        out_shape=jax.ShapeDtypeStruct((N, C, HW), x.dtype),
        grid=(N, n_s, n_c),
        in_specs=[
            pl.BlockSpec((1, tc, thw), lambda n, s, c: (n, c, s)),
            pl.BlockSpec((1, 1, thw), lambda n, s, c: (n, 0, s)),
        ],
        out_specs=pl.BlockSpec((1, tc, thw), lambda n, s, c: (n, c, s)),
        compiler_params=pltpu.CompilerParams(
            dimension_semantics=("parallel", "parallel", "parallel"),
            vmem_limit_bytes=_vmem_limit(4 * tc * thw * eb + 2 * thw * 4, cap)),
    )(x_flat, attn)

    return out_flat.reshape(N, C, H, W)


# ---------------------------------------------------------------------------
# Pure-JAX reference (mirrors the PyTorch module)
# ---------------------------------------------------------------------------
def sam_reference(x, conv_weight):
    avg = jnp.mean(x, axis=1, keepdims=True)
    mx = jnp.max(x, axis=1, keepdims=True)
    cat = jnp.concatenate([avg, mx], axis=1)                      # (N, 2, H, W)
    conv = jax.lax.conv_general_dilated(
        cat, conv_weight, window_strides=(1, 1),
        padding=((PAD, PAD), (PAD, PAD)),
        dimension_numbers=("NCHW", "OIHW", "NCHW"))
    return x * jax.nn.sigmoid(conv)


if __name__ == "__main__":
    key = jax.random.PRNGKey(0)
    kx, kw, kx2 = jax.random.split(key, 3)

    # Primary small test: fused single-pass path.
    N, C, H, W = 2, 4, 16, 16
    x = jax.random.normal(kx, (N, C, H, W), dtype=jnp.float32)
    conv_weight = 0.1 * jax.random.normal(kw, (1, 2, KSIZE, KSIZE),
                                          dtype=jnp.float32)

    fused_fn = jax.jit(sam_forward)
    out = jax.block_until_ready(fused_fn(x, conv_weight))
    ref = jax.block_until_ready(sam_reference(x, conv_weight))
    assert out.shape == (N, C, H, W)
    assert jnp.allclose(out, ref, atol=1e-5, rtol=1e-5), "mismatch (fused)"

    # Second test exercises the tiled fallback with a tiny budget:
    # ragged channel tiles (C=12, tc=8) + spatial tiling (thw=128 of HW=256).
    N2, C2, H2, W2 = 2, 12, 8, 32
    x2 = jax.random.normal(kx2, (N2, C2, H2, W2), dtype=jnp.float32)
    tiled_fn = jax.jit(
        lambda a, w: sam_forward(a, w, block_budget_bytes=4096,
                                 allow_fused=False))
    out2 = jax.block_until_ready(tiled_fn(x2, conv_weight))
    ref2 = jax.block_until_ready(sam_reference(x2, conv_weight))
    assert jnp.allclose(out2, ref2, atol=1e-5, rtol=1e-5), "mismatch (tiled)"

    print("KERNEL_OK")
</pallas_src>

<mosaic_0001>
module attributes {stable_mosaic.version = 11 : i64} {
  func.func @kernel(%arg0: i32, %arg1: memref<98xf32, #tpu.memory_space<smem>>, %arg2: memref<1x4x256xf32, #tpu.memory_space<vmem>>, %arg3: memref<14x256xf32, #tpu.memory_space<vmem>>, %arg4: memref<1x4x256xf32, #tpu.memory_space<vmem>>) attributes {dimension_semantics = [#tpu.dimension_semantics<parallel>], iteration_bounds = array<i64: 2>, scalar_prefetch = 0 : i64, scratch_operands = 0 : i64, tpu.core_type = #tpu.core_type<tc>, window_params = [{transform_indices = @transform_0, window_bounds = array<i64: 98>}, {transform_indices = @transform_1, window_bounds = array<i64: 1, 4, 256>}, {pipeline_mode = #tpu.pipeline_mode<synchronous>, transform_indices = @transform_2, window_bounds = array<i64: 14, 256>}, {transform_indices = @transform_3, window_bounds = array<i64: 1, 4, 256>}]} {
    %c0 = arith.constant 0 : index
    %c0_0 = arith.constant 0 : index
    %c0_1 = arith.constant 0 : index
    %0 = vector.load %arg2[%c0, %c0_0, %c0_1] : memref<1x4x256xf32, #tpu.memory_space<vmem>>, vector<1x4x256xf32>
    %1 = vector.shape_cast %0 : vector<1x4x256xf32> to vector<4x256xf32>
    %cst = arith.constant dense<0.000000e+00> : vector<256xf32>
    %2 = vector.multi_reduction <add>, %1, %cst [0] : vector<4x256xf32> to vector<256xf32>
    %3 = vector.shape_cast %2 : vector<256xf32> to vector<1x256xf32>
    %cst_2 = arith.constant dense<0xFF800000> : vector<256xf32>
    %4 = vector.multi_reduction <maximumf>, %1, %cst_2 [0] : vector<4x256xf32> to vector<256xf32>
    %5 = vector.shape_cast %4 : vector<256xf32> to vector<1x256xf32>
    %c0_3 = arith.constant 0 : index
    %c0_4 = arith.constant 0 : index
    %6 = vector.load %arg3[%c0_3, %c0_4] : memref<14x256xf32, #tpu.memory_space<vmem>>, vector<1x256xf32>
    %7 = vector.extract_strided_slice %3 {offsets = [0, 253], sizes = [1, 3], strides = [1, 1]} : vector<1x256xf32> to vector<1x3xf32>
    %8 = vector.extract_strided_slice %3 {offsets = [0, 0], sizes = [1, 253], strides = [1, 1]} : vector<1x256xf32> to vector<1x253xf32>
    %9 = tpu.concatenate %7, %8 in 1 : vector<1x3xf32>, vector<1x253xf32> -> vector<1x256xf32>
    %10 = arith.mulf %6, %9 : vector<1x256xf32>
    %11 = vector.extract_strided_slice %5 {offsets = [0, 253], sizes = [1, 3], strides = [1, 1]} : vector<1x256xf32> to vector<1x3xf32>
    %12 = vector.extract_strided_slice %5 {offsets = [0, 0], sizes = [1, 253], strides = [1, 1]} : vector<1x256xf32> to vector<1x253xf32>
    %13 = tpu.concatenate %11, %12 in 1 : vector<1x3xf32>, vector<1x253xf32> -> vector<1x256xf32>
    %14 = arith.mulf %6, %13 : vector<1x256xf32>
    %c1 = arith.constant 1 : index
    %c0_5 = arith.constant 0 : index
    %15 = vector.load %arg3[%c1, %c0_5] : memref<14x256xf32, #tpu.memory_space<vmem>>, vector<1x256xf32>
    %16 = vector.extract_strided_slice %3 {offsets = [0, 254], sizes = [1, 2], strides = [1, 1]} : vector<1x256xf32> to vector<1x2xf32>
    %17 = vector.extract_strided_slice %3 {offsets = [0, 0], sizes = [1, 254], strides = [1, 1]} : vector<1x256xf32> to vector<1x254xf32>
    %18 = tpu.concatenate %16, %17 in 1 : vector<1x2xf32>, vector<1x254xf32> -> vector<1x256xf32>
    %19 = arith.mulf %15, %18 : vector<1x256xf32>
    %20 = vector.extract_strided_slice %5 {offsets = [0, 254], sizes = [1, 2], strides = [1, 1]} : vector<1x256xf32> to vector<1x2xf32>
    %21 = vector.extract_strided_slice %5 {offsets = [0, 0], sizes = [1, 254], strides = [1, 1]} : vector<1x256xf32> to vector<1x254xf32>
    %22 = tpu.concatenate %20, %21 in 1 : vector<1x2xf32>, vector<1x254xf32> -> vector<1x256xf32>
    %23 = arith.mulf %15, %22 : vector<1x256xf32>
    %c2 = arith.constant 2 : index
    %c0_6 = arith.constant 0 : index
    %24 = vector.load %arg3[%c2, %c0_6] : memref<14x256xf32, #tpu.memory_space<vmem>>, vector<1x256xf32>
    %25 = vector.extract_strided_slice %3 {offsets = [0, 255], sizes = [1, 1], strides = [1, 1]} : vector<1x256xf32> to vector<1x1xf32>
    %26 = vector.extract_strided_slice %3 {offsets = [0, 0], sizes = [1, 255], strides = [1, 1]} : vector<1x256xf32> to vector<1x255xf32>
    %27 = tpu.concatenate %25, %26 in 1 : vector<1x1xf32>, vector<1x255xf32> -> vector<1x256xf32>
    %28 = arith.mulf %24, %27 : vector<1x256xf32>
    %29 = vector.extract_strided_slice %5 {offsets = [0, 255], sizes = [1, 1], strides = [1, 1]} : vector<1x256xf32> to vector<1x1xf32>
    %30 = vector.extract_strided_slice %5 {offsets = [0, 0], sizes = [1, 255], strides = [1, 1]} : vector<1x256xf32> to vector<1x255xf32>
    %31 = tpu.concatenate %29, %30 in 1 : vector<1x1xf32>, vector<1x255xf32> -> vector<1x256xf32>
    %32 = arith.mulf %24, %31 : vector<1x256xf32>
    %c3 = arith.constant 3 : index
    %c0_7 = arith.constant 0 : index
    %33 = vector.load %arg3[%c3, %c0_7] : memref<14x256xf32, #tpu.memory_space<vmem>>, vector<1x256xf32>
    %34 = arith.mulf %33, %3 : vector<1x256xf32>
    %35 = arith.mulf %33, %5 : vector<1x256xf32>
    %c4 = arith.constant 4 : index
    %c0_8 = arith.constant 0 : index
    %36 = vector.load %arg3[%c4, %c0_8] : memref<14x256xf32, #tpu.memory_space<vmem>>, vector<1x256xf32>
    %37 = vector.extract_strided_slice %3 {offsets = [0, 1], sizes = [1, 255], strides = [1, 1]} : vector<1x256xf32> to vector<1x255xf32>
    %38 = vector.extract_strided_slice %3 {offsets = [0, 0], sizes = [1, 1], strides = [1, 1]} : vector<1x256xf32> to vector<1x1xf32>
    %39 = tpu.concatenate %37, %38 in 1 : vector<1x255xf32>, vector<1x1xf32> -> vector<1x256xf32>
    %40 = arith.mulf %36, %39 : vector<1x256xf32>
    %41 = vector.extract_strided_slice %5 {offsets = [0, 1], sizes = [1, 255], strides = [1, 1]} : vector<1x256xf32> to vector<1x255xf32>
    %42 = vector.extract_strided_slice %5 {offsets = [0, 0], sizes = [1, 1], strides = [1, 1]} : vector<1x256xf32> to vector<1x1xf32>
    %43 = tpu.concatenate %41, %42 in 1 : vector<1x255xf32>, vector<1x1xf32> -> vector<1x256xf32>
    %44 = arith.mulf %36, %43 : vector<1x256xf32>
    %c5 = arith.constant 5 : index
    %c0_9 = arith.constant 0 : index
    %45 = vector.load %arg3[%c5, %c0_9] : memref<14x256xf32, #tpu.memory_space<vmem>>, vector<1x256xf32>
    %46 = vector.extract_strided_slice %3 {offsets = [0, 2], sizes = [1, 254], strides = [1, 1]} : vector<1x256xf32> to vector<1x254xf32>
    %47 = vector.extract_strided_slice %3 {offsets = [0, 0], sizes = [1, 2], strides = [1, 1]} : vector<1x256xf32> to vector<1x2xf32>
    %48 = tpu.concatenate %46, %47 in 1 : vector<1x254xf32>, vector<1x2xf32> -> vector<1x256xf32>
    %49 = arith.mulf %45, %48 : vector<1x256xf32>
    %50 = vector.extract_strided_slice %5 {offsets = [0, 2], sizes = [1, 254], strides = [1, 1]} : vector<1x256xf32> to vector<1x254xf32>
    %51 = vector.extract_strided_slice %5 {offsets = [0, 0], sizes = [1, 2], strides = [1, 1]} : vector<1x256xf32> to vector<1x2xf32>
    %52 = tpu.concatenate %50, %51 in 1 : vector<1x254xf32>, vector<1x2xf32> -> vector<1x256xf32>
    %53 = arith.mulf %45, %52 : vector<1x256xf32>
    %c6 = arith.constant 6 : index
    %c0_10 = arith.constant 0 : index
    %54 = vector.load %arg3[%c6, %c0_10] : memref<14x256xf32, #tpu.memory_space<vmem>>, vector<1x256xf32>
    %55 = vector.extract_strided_slice %3 {offsets = [0, 3], sizes = [1, 253], strides = [1, 1]} : vector<1x256xf32> to vector<1x253xf32>
    %56 = vector.extract_strided_slice %3 {offsets = [0, 0], sizes = [1, 3], strides = [1, 1]} : vector<1x256xf32> to vector<1x3xf32>
    %57 = tpu.concatenate %55, %56 in 1 : vector<1x253xf32>, vector<1x3xf32> -> vector<1x256xf32>
    %58 = arith.mulf %54, %57 : vector<1x256xf32>
    %59 = vector.extract_strided_slice %5 {offsets = [0, 3], sizes = [1, 253], strides = [1, 1]} : vector<1x256xf32> to vector<1x253xf32>
    %60 = vector.extract_strided_slice %5 {offsets = [0, 0], sizes = [1, 3], strides = [1, 1]} : vector<1x256xf32> to vector<1x3xf32>
    %61 = tpu.concatenate %59, %60 in 1 : vector<1x253xf32>, vector<1x3xf32> -> vector<1x256xf32>
    %62 = arith.mulf %54, %61 : vector<1x256xf32>
    %cst_11 = arith.constant 0.000000e+00 : f32
    %63 = vector.broadcast %cst_11 : f32 to vector<1x256xf32>
    %cst_12 = arith.constant 0.000000e+00 : f32
    %64 = vector.broadcast %cst_12 : f32 to vector<1x256xf32>
    %c0_13 = arith.constant 0 : index
    %65 = memref.load %arg1[%c0_13] : memref<98xf32, #tpu.memory_space<smem>>
    %c49 = arith.constant 49 : index
    %66 = memref.load %arg1[%c49] : memref<98xf32, #tpu.memory_space<smem>>
    %67 = vector.broadcast %65 : f32 to vector<1x256xf32>
    %68 = arith.mulf %67, %10 : vector<1x256xf32>
    %69 = vector.broadcast %66 : f32 to vector<1x256xf32>
    %70 = arith.mulf %69, %14 : vector<1x256xf32>
    %71 = arith.addf %68, %70 : vector<1x256xf32>
    %72 = arith.addf %64, %71 : vector<1x256xf32>
    %c1_14 = arith.constant 1 : index
    %73 = memref.load %arg1[%c1_14] : memref<98xf32, #tpu.memory_space<smem>>
    %c50 = arith.constant 50 : index
    %74 = memref.load %arg1[%c50] : memref<98xf32, #tpu.memory_space<smem>>
    %75 = vector.broadcast %73 : f32 to vector<1x256xf32>
    %76 = arith.mulf %75, %19 : vector<1x256xf32>
    %77 = vector.broadcast %74 : f32 to vector<1x256xf32>
    %78 = arith.mulf %77, %23 : vector<1x256xf32>
    %79 = arith.addf %76, %78 : vector<1x256xf32>
    %80 = arith.addf %72, %79 : vector<1x256xf32>
    %c2_15 = arith.constant 2 : index
    %81 = memref.load %arg1[%c2_15] : memref<98xf32, #tpu.memory_space<smem>>
    %c51 = arith.constant 51 : index
    %82 = memref.load %arg1[%c51] : memref<98xf32, #tpu.memory_space<smem>>
    %83 = vector.broadcast %81 : f32 to vector<1x256xf32>
    %84 = arith.mulf %83, %28 : vector<1x256xf32>
    %85 = vector.broadcast %82 : f32 to vector<1x256xf32>
    %86 = arith.mulf %85, %32 : vector<1x256xf32>
    %87 = arith.addf %84, %86 : vector<1x256xf32>
    %88 = arith.addf %80, %87 : vector<1x256xf32>
    %c3_16 = arith.constant 3 : index
    %89 = memref.load %arg1[%c3_16] : memref<98xf32, #tpu.memory_space<smem>>
    %c52 = arith.constant 52 : index
    %90 = memref.load %arg1[%c52] : memref<98xf32, #tpu.memory_space<smem>>
    %91 = vector.broadcast %89 : f32 to vector<1x256xf32>
    %92 = arith.mulf %91, %34 : vector<1x256xf32>
    %93 = vector.broadcast %90 : f32 to vector<1x256xf32>
    %94 = arith.mulf %93, %35 : vector<1x256xf32>
    %95 = arith.addf %92, %94 : vector<1x256xf32>
    %96 = arith.addf %88, %95 : vector<1x256xf32>
    %c4_17 = arith.constant 4 : index
    %97 = memref.load %arg1[%c4_17] : memref<98xf32, #tpu.memory_space<smem>>
    %c53 = arith.constant 53 : index
    %98 = memref.load %arg1[%c53] : memref<98xf32, #tpu.memory_space<smem>>
    %99 = vector.broadcast %97 : f32 to vector<1x256xf32>
    %100 = arith.mulf %99, %40 : vector<1x256xf32>
    %101 = vector.broadcast %98 : f32 to vector<1x256xf32>
    %102 = arith.mulf %101, %44 : vector<1x256xf32>
    %103 = arith.addf %100, %102 : vector<1x256xf32>
    %104 = arith.addf %96, %103 : vector<1x256xf32>
    %c5_18 = arith.constant 5 : index
    %105 = memref.load %arg1[%c5_18] : memref<98xf32, #tpu.memory_space<smem>>
    %c54 = arith.constant 54 : index
    %106 = memref.load %arg1[%c54] : memref<98xf32, #tpu.memory_space<smem>>
    %107 = vector.broadcast %105 : f32 to vector<1x256xf32>
    %108 = arith.mulf %107, %49 : vector<1x256xf32>
    %109 = vector.broadcast %106 : f32 to vector<1x256xf32>
    %110 = arith.mulf %109, %53 : vector<1x256xf32>
    %111 = arith.addf %108, %110 : vector<1x256xf32>
    %112 = arith.addf %104, %111 : vector<1x256xf32>
    %c6_19 = arith.constant 6 : index
    %113 = memref.load %arg1[%c6_19] : memref<98xf32, #tpu.memory_space<smem>>
    %c55 = arith.constant 55 : index
    %114 = memref.load %arg1[%c55] : memref<98xf32, #tpu.memory_space<smem>>
    %115 = vector.broadcast %113 : f32 to vector<1x256xf32>
    %116 = arith.mulf %115, %58 : vector<1x256xf32>
    %117 = vector.broadcast %114 : f32 to vector<1x256xf32>
    %118 = arith.mulf %117, %62 : vector<1x256xf32>
    %119 = arith.addf %116, %118 : vector<1x256xf32>
    %120 = arith.addf %112, %119 : vector<1x256xf32>
    %c7 = arith.constant 7 : index
    %c0_20 = arith.constant 0 : index
    %121 = vector.load %arg3[%c7, %c0_20] : memref<14x256xf32, #tpu.memory_space<vmem>>, vector<1x256xf32>
    %122 = vector.extract_strided_slice %120 {offsets = [0, 208], sizes = [1, 48], strides = [1, 1]} : vector<1x256xf32> to vector<1x48xf32>
    %123 = vector.extract_strided_slice %120 {offsets = [0, 0], sizes = [1, 208], strides = [1, 1]} : vector<1x256xf32> to vector<1x208xf32>
    %124 = tpu.concatenate %122, %123 in 1 : vector<1x48xf32>, vector<1x208xf32> -> vector<1x256xf32>
    %125 = arith.mulf %121, %124 : vector<1x256xf32>
    %126 = arith.addf %63, %125 : vector<1x256xf32>
    %cst_21 = arith.constant 0.000000e+00 : f32
    %127 = vector.broadcast %cst_21 : f32 to vector<1x256xf32>
    %c7_22 = arith.constant 7 : index
    %128 = memref.load %arg1[%c7_22] : memref<98xf32, #tpu.memory_space<smem>>
    %c56 = arith.constant 56 : index
    %129 = memref.load %arg1[%c56] : memref<98xf32, #tpu.memory_space<smem>>
    %130 = vector.broadcast %128 : f32 to vector<1x256xf32>
    %131 = arith.mulf %130, %10 : vector<1x256xf32>
    %132 = vector.broadcast %129 : f32 to vector<1x256xf32>
    %133 = arith.mulf %132, %14 : vector<1x256xf32>
    %134 = arith.addf %131, %133 : vector<1x256xf32>
    %135 = arith.addf %127, %134 : vector<1x256xf32>
    %c8 = arith.constant 8 : index
    %136 = memref.load %arg1[%c8] : memref<98xf32, #tpu.memory_space<smem>>
    %c57 = arith.constant 57 : index
    %137 = memref.load %arg1[%c57] : memref<98xf32, #tpu.memory_space<smem>>
    %138 = vector.broadcast %136 : f32 to vector<1x256xf32>
    %139 = arith.mulf %138, %19 : vector<1x256xf32>
    %140 = vector.broadcast %137 : f32 to vector<1x256xf32>
    %141 = arith.mulf %140, %23 : vector<1x256xf32>
    %142 = arith.addf %139, %141 : vector<1x256xf32>
    %143 = arith.addf %135, %142 : vector<1x256xf32>
    %c9 = arith.constant 9 : index
    %144 = memref.load %arg1[%c9] : memref<98xf32, #tpu.memory_space<smem>>
    %c58 = arith.constant 58 : index
    %145 = memref.load %arg1[%c58] : memref<98xf32, #tpu.memory_space<smem>>
    %146 = vector.broadcast %144 : f32 to vector<1x256xf32>
    %147 = arith.mulf %146, %28 : vector<1x256xf32>
    %148 = vector.broadcast %145 : f32 to vector<1x256xf32>
    %149 = arith.mulf %148, %32 : vector<1x256xf32>
    %150 = arith.addf %147, %149 : vector<1x256xf32>
    %151 = arith.addf %143, %150 : vector<1x256xf32>
    %c10 = arith.constant 10 : index
    %152 = memref.load %arg1[%c10] : memref<98xf32, #tpu.memory_space<smem>>
    %c59 = arith.constant 59 : index
    %153 = memref.load %arg1[%c59] : memref<98xf32, #tpu.memory_space<smem>>
    %154 = vector.broadcast %152 : f32 to vector<1x256xf32>
    %155 = arith.mulf %154, %34 : vector<1x256xf32>
    %156 = vector.broadcast %153 : f32 to vector<1x256xf32>
    %157 = arith.mulf %156, %35 : vector<1x256xf32>
    %158 = arith.addf %155, %157 : vector<1x256xf32>
    %159 = arith.addf %151, %158 : vector<1x256xf32>
    %c11 = arith.constant 11 : index
    %160 = memref.load %arg1[%c11] : memref<98xf32, #tpu.memory_space<smem>>
    %c60 = arith.constant 60 : index
    %161 = memref.load %arg1[%c60] : memref<98xf32, #tpu.memory_space<smem>>
    %162 = vector.broadcast %160 : f32 to vector<1x256xf32>
    %163 = arith.mulf %162, %40 : vector<1x256xf32>
    %164 = vector.broadcast %161 : f32 to vector<1x256xf32>
    %165 = arith.mulf %164, %44 : vector<1x256xf32>
    %166 = arith.addf %163, %165 : vector<1x256xf32>
    %167 = arith.addf %159, %166 : vector<1x256xf32>
    %c12 = arith.constant 12 : index
    %168 = memref.load %arg1[%c12] : memref<98xf32, #tpu.memory_space<smem>>
    %c61 = arith.constant 61 : index
    %169 = memref.load %arg1[%c61] : memref<98xf32, #tpu.memory_space<smem>>
    %170 = vector.broadcast %168 : f32 to vector<1x256xf32>
    %171 = arith.mulf %170, %49 : vector<1x256xf32>
    %172 = vector.broadcast %169 : f32 to vector<1x256xf32>
    %173 = arith.mulf %172, %53 : vector<1x256xf32>
    %174 = arith.addf %171, %173 : vector<1x256xf32>
    %175 = arith.addf %167, %174 : vector<1x256xf32>
    %c13 = arith.constant 13 : index
    %176 = memref.load %arg1[%c13] : memref<98xf32, #tpu.memory_space<smem>>
    %c62 = arith.constant 62 : index
    %177 = memref.load %arg1[%c62] : memref<98xf32, #tpu.memory_space<smem>>
    %178 = vector.broadcast %176 : f32 to vector<1x256xf32>
    %179 = arith.mulf %178, %58 : vector<1x256xf32>
    %180 = vector.broadcast %177 : f32 to vector<1x256xf32>
    %181 = arith.mulf %180, %62 : vector<1x256xf32>
    %182 = arith.addf %179, %181 : vector<1x256xf32>
    %183 = arith.addf %175, %182 : vector<1x256xf32>
    %c8_23 = arith.constant 8 : index
    %c0_24 = arith.constant 0 : index
    %184 = vector.load %arg3[%c8_23, %c0_24] : memref<14x256xf32, #tpu.memory_space<vmem>>, vector<1x256xf32>
    %185 = vector.extract_strided_slice %183 {offsets = [0, 224], sizes = [1, 32], strides = [1, 1]} : vector<1x256xf32> to vector<1x32xf32>
    %186 = vector.extract_strided_slice %183 {offsets = [0, 0], sizes = [1, 224], strides = [1, 1]} : vector<1x256xf32> to vector<1x224xf32>
    %187 = tpu.concatenate %185, %186 in 1 : vector<1x32xf32>, vector<1x224xf32> -> vector<1x256xf32>
    %188 = arith.mulf %184, %187 : vector<1x256xf32>
    %189 = arith.addf %126, %188 : vector<1x256xf32>
    %cst_25 = arith.constant 0.000000e+00 : f32
    %190 = vector.broadcast %cst_25 : f32 to vector<1x256xf32>
    %c14 = arith.constant 14 : index
    %191 = memref.load %arg1[%c14] : memref<98xf32, #tpu.memory_space<smem>>
    %c63 = arith.constant 63 : index
    %192 = memref.load %arg1[%c63] : memref<98xf32, #tpu.memory_space<smem>>
    %193 = vector.broadcast %191 : f32 to vector<1x256xf32>
    %194 = arith.mulf %193, %10 : vector<1x256xf32>
    %195 = vector.broadcast %192 : f32 to vector<1x256xf32>
    %196 = arith.mulf %195, %14 : vector<1x256xf32>
    %197 = arith.addf %194, %196 : vector<1x256xf32>
    %198 = arith.addf %190, %197 : vector<1x256xf32>
    %c15 = arith.constant 15 : index
    %199 = memref.load %arg1[%c15] : memref<98xf32, #tpu.memory_space<smem>>
    %c64 = arith.constant 64 : index
    %200 = memref.load %arg1[%c64] : memref<98xf32, #tpu.memory_space<smem>>
    %201 = vector.broadcast %199 : f32 to vector<1x256xf32>
    %202 = arith.mulf %201, %19 : vector<1x256xf32>
    %203 = vector.broadcast %200 : f32 to vector<1x256xf32>
    %204 = arith.mulf %203, %23 : vector<1x256xf32>
    %205 = arith.addf %202, %204 : vector<1x256xf32>
    %206 = arith.addf %198, %205 : vector<1x256xf32>
    %c16 = arith.constant 16 : index
    %207 = memref.load %arg1[%c16] : memref<98xf32, #tpu.memory_space<smem>>
    %c65 = arith.constant 65 : index
    %208 = memref.load %arg1[%c65] : memref<98xf32, #tpu.memory_space<smem>>
    %209 = vector.broadcast %207 : f32 to vector<1x256xf32>
    %210 = arith.mulf %209, %28 : vector<1x256xf32>
    %211 = vector.broadcast %208 : f32 to vector<1x256xf32>
    %212 = arith.mulf %211, %32 : vector<1x256xf32>
    %213 = arith.addf %210, %212 : vector<1x256xf32>
    %214 = arith.addf %206, %213 : vector<1x256xf32>
    %c17 = arith.constant 17 : index
    %215 = memref.load %arg1[%c17] : memref<98xf32, #tpu.memory_space<smem>>
    %c66 = arith.constant 66 : index
    %216 = memref.load %arg1[%c66] : memref<98xf32, #tpu.memory_space<smem>>
    %217 = vector.broadcast %215 : f32 to vector<1x256xf32>
    %218 = arith.mulf %217, %34 : vector<1x256xf32>
    %219 = vector.broadcast %216 : f32 to vector<1x256xf32>
    %220 = arith.mulf %219, %35 : vector<1x256xf32>
    %221 = arith.addf %218, %220 : vector<1x256xf32>
    %222 = arith.addf %214, %221 : vector<1x256xf32>
    %c18 = arith.constant 18 : index
    %223 = memref.load %arg1[%c18] : memref<98xf32, #tpu.memory_space<smem>>
    %c67 = arith.constant 67 : index
    %224 = memref.load %arg1[%c67] : memref<98xf32, #tpu.memory_space<smem>>
    %225 = vector.broadcast %223 : f32 to vector<1x256xf32>
    %226 = arith.mulf %225, %40 : vector<1x256xf32>
    %227 = vector.broadcast %224 : f32 to vector<1x256xf32>
    %228 = arith.mulf %227, %44 : vector<1x256xf32>
    %229 = arith.addf %226, %228 : vector<1x256xf32>
    %230 = arith.addf %222, %229 : vector<1x256xf32>
    %c19 = arith.constant 19 : index
    %231 = memref.load %arg1[%c19] : memref<98xf32, #tpu.memory_space<smem>>
    %c68 = arith.constant 68 : index
    %232 = memref.load %arg1[%c68] : memref<98xf32, #tpu.memory_space<smem>>
    %233 = vector.broadcast %231 : f32 to vector<1x256xf32>
    %234 = arith.mulf %233, %49 : vector<1x256xf32>
    %235 = vector.broadcast %232 : f32 to vector<1x256xf32>
    %236 = arith.mulf %235, %53 : vector<1x256xf32>
    %237 = arith.addf %234, %236 : vector<1x256xf32>
    %238 = arith.addf %230, %237 : vector<1x256xf32>
    %c20 = arith.constant 20 : index
    %239 = memref.load %arg1[%c20] : memref<98xf32, #tpu.memory_space<smem>>
    %c69 = arith.constant 69 : index
    %240 = memref.load %arg1[%c69] : memref<98xf32, #tpu.memory_space<smem>>
    %241 = vector.broadcast %239 : f32 to vector<1x256xf32>
    %242 = arith.mulf %241, %58 : vector<1x256xf32>
    %243 = vector.broadcast %240 : f32 to vector<1x256xf32>
    %244 = arith.mulf %243, %62 : vector<1x256xf32>
    %245 = arith.addf %242, %244 : vector<1x256xf32>
    %246 = arith.addf %238, %245 : vector<1x256xf32>
    %c9_26 = arith.constant 9 : index
    %c0_27 = arith.constant 0 : index
    %247 = vector.load %arg3[%c9_26, %c0_27] : memref<14x256xf32, #tpu.memory_space<vmem>>, vector<1x256xf32>
    %248 = vector.extract_strided_slice %246 {offsets = [0, 240], sizes = [1, 16], strides = [1, 1]} : vector<1x256xf32> to vector<1x16xf32>
    %249 = vector.extract_strided_slice %246 {offsets = [0, 0], sizes = [1, 240], strides = [1, 1]} : vector<1x256xf32> to vector<1x240xf32>
    %250 = tpu.concatenate %248, %249 in 1 : vector<1x16xf32>, vector<1x240xf32> -> vector<1x256xf32>
    %251 = arith.mulf %247, %250 : vector<1x256xf32>
    %252 = arith.addf %189, %251 : vector<1x256xf32>
    %cst_28 = arith.constant 0.000000e+00 : f32
    %253 = vector.broadcast %cst_28 : f32 to vector<1x256xf32>
    %c21 = arith.constant 21 : index
    %254 = memref.load %arg1[%c21] : memref<98xf32, #tpu.memory_space<smem>>
    %c70 = arith.constant 70 : index
    %255 = memref.load %arg1[%c70] : memref<98xf32, #tpu.memory_space<smem>>
    %256 = vector.broadcast %254 : f32 to vector<1x256xf32>
    %257 = arith.mulf %256, %10 : vector<1x256xf32>
    %258 = vector.broadcast %255 : f32 to vector<1x256xf32>
    %259 = arith.mulf %258, %14 : vector<1x256xf32>
    %260 = arith.addf %257, %259 : vector<1x256xf32>
    %261 = arith.addf %253, %260 : vector<1x256xf32>
    %c22 = arith.constant 22 : index
    %262 = memref.load %arg1[%c22] : memref<98xf32, #tpu.memory_space<smem>>
    %c71 = arith.constant 71 : index
    %263 = memref.load %arg1[%c71] : memref<98xf32, #tpu.memory_space<smem>>
    %264 = vector.broadcast %262 : f32 to vector<1x256xf32>
    %265 = arith.mulf %264, %19 : vector<1x256xf32>
    %266 = vector.broadcast %263 : f32 to vector<1x256xf32>
    %267 = arith.mulf %266, %23 : vector<1x256xf32>
    %268 = arith.addf %265, %267 : vector<1x256xf32>
    %269 = arith.addf %261, %268 : vector<1x256xf32>
    %c23 = arith.constant 23 : index
    %270 = memref.load %arg1[%c23] : memref<98xf32, #tpu.memory_space<smem>>
    %c72 = arith.constant 72 : index
    %271 = memref.load %arg1[%c72] : memref<98xf32, #tpu.memory_space<smem>>
    %272 = vector.broadcast %270 : f32 to vector<1x256xf32>
    %273 = arith.mulf %272, %28 : vector<1x256xf32>
    %274 = vector.broadcast %271 : f32 to vector<1x256xf32>
    %275 = arith.mulf %274, %32 : vector<1x256xf32>
    %276 = arith.addf %273, %275 : vector<1x256xf32>
    %277 = arith.addf %269, %276 : vector<1x256xf32>
    %c24 = arith.constant 24 : index
    %278 = memref.load %arg1[%c24] : memref<98xf32, #tpu.memory_space<smem>>
    %c73 = arith.constant 73 : index
    %279 = memref.load %arg1[%c73] : memref<98xf32, #tpu.memory_space<smem>>
    %280 = vector.broadcast %278 : f32 to vector<1x256xf32>
    %281 = arith.mulf %280, %34 : vector<1x256xf32>
    %282 = vector.broadcast %279 : f32 to vector<1x256xf32>
    %283 = arith.mulf %282, %35 : vector<1x256xf32>
    %284 = arith.addf %281, %283 : vector<1x256xf32>
    %285 = arith.addf %277, %284 : vector<1x256xf32>
    %c25 = arith.constant 25 : index
    %286 = memref.load %arg1[%c25] : memref<98xf32, #tpu.memory_space<smem>>
    %c74 = arith.constant 74 : index
    %287 = memref.load %arg1[%c74] : memref<98xf32, #tpu.memory_space<smem>>
    %288 = vector.broadcast %286 : f32 to vector<1x256xf32>
    %289 = arith.mulf %288, %40 : vector<1x256xf32>
    %290 = vector.broadcast %287 : f32 to vector<1x256xf32>
    %291 = arith.mulf %290, %44 : vector<1x256xf32>
    %292 = arith.addf %289, %291 : vector<1x256xf32>
    %293 = arith.addf %285, %292 : vector<1x256xf32>
    %c26 = arith.constant 26 : index
    %294 = memref.load %arg1[%c26] : memref<98xf32, #tpu.memory_space<smem>>
    %c75 = arith.constant 75 : index
    %295 = memref.load %arg1[%c75] : memref<98xf32, #tpu.memory_space<smem>>
    %296 = vector.broadcast %294 : f32 to vector<1x256xf32>
    %297 = arith.mulf %296, %49 : vector<1x256xf32>
    %298 = vector.broadcast %295 : f32 to vector<1x256xf32>
    %299 = arith.mulf %298, %53 : vector<1x256xf32>
    %300 = arith.addf %297, %299 : vector<1x256xf32>
    %301 = arith.addf %293, %300 : vector<1x256xf32>
    %c27 = arith.constant 27 : index
    %302 = memref.load %arg1[%c27] : memref<98xf32, #tpu.memory_space<smem>>
    %c76 = arith.constant 76 : index
    %303 = memref.load %arg1[%c76] : memref<98xf32, #tpu.memory_space<smem>>
    %304 = vector.broadcast %302 : f32 to vector<1x256xf32>
    %305 = arith.mulf %304, %58 : vector<1x256xf32>
    %306 = vector.broadcast %303 : f32 to vector<1x256xf32>
    %307 = arith.mulf %306, %62 : vector<1x256xf32>
    %308 = arith.addf %305, %307 : vector<1x256xf32>
    %309 = arith.addf %301, %308 : vector<1x256xf32>
    %c10_29 = arith.constant 10 : index
    %c0_30 = arith.constant 0 : index
    %310 = vector.load %arg3[%c10_29, %c0_30] : memref<14x256xf32, #tpu.memory_space<vmem>>, vector<1x256xf32>
    %311 = arith.mulf %310, %309 : vector<1x256xf32>
    %312 = arith.addf %252, %311 : vector<1x256xf32>
    %cst_31 = arith.constant 0.000000e+00 : f32
    %313 = vector.broadcast %cst_31 : f32 to vector<1x256xf32>
    %c28 = arith.constant 28 : index
    %314 = memref.load %arg1[%c28] : memref<98xf32, #tpu.memory_space<smem>>
    %c77 = arith.constant 77 : index
    %315 = memref.load %arg1[%c77] : memref<98xf32, #tpu.memory_space<smem>>
    %316 = vector.broadcast %314 : f32 to vector<1x256xf32>
    %317 = arith.mulf %316, %10 : vector<1x256xf32>
    %318 = vector.broadcast %315 : f32 to vector<1x256xf32>
    %319 = arith.mulf %318, %14 : vector<1x256xf32>
    %320 = arith.addf %317, %319 : vector<1x256xf32>
    %321 = arith.addf %313, %320 : vector<1x256xf32>
    %c29 = arith.constant 29 : index
    %322 = memref.load %arg1[%c29] : memref<98xf32, #tpu.memory_space<smem>>
    %c78 = arith.constant 78 : index
    %323 = memref.load %arg1[%c78] : memref<98xf32, #tpu.memory_space<smem>>
    %324 = vector.broadcast %322 : f32 to vector<1x256xf32>
    %325 = arith.mulf %324, %19 : vector<1x256xf32>
    %326 = vector.broadcast %323 : f32 to vector<1x256xf32>
    %327 = arith.mulf %326, %23 : vector<1x256xf32>
    %328 = arith.addf %325, %327 : vector<1x256xf32>
    %329 = arith.addf %321, %328 : vector<1x256xf32>
    %c30 = arith.constant 30 : index
    %330 = memref.load %arg1[%c30] : memref<98xf32, #tpu.memory_space<smem>>
    %c79 = arith.constant 79 : index
    %331 = memref.load %arg1[%c79] : memref<98xf32, #tpu.memory_space<smem>>
    %332 = vector.broadcast %330 : f32 to vector<1x256xf32>
    %333 = arith.mulf %332, %28 : vector<1x256xf32>
    %334 = vector.broadcast %331 : f32 to vector<1x256xf32>
    %335 = arith.mulf %334, %32 : vector<1x256xf32>
    %336 = arith.addf %333, %335 : vector<1x256xf32>
    %337 = arith.addf %329, %336 : vector<1x256xf32>
    %c31 = arith.constant 31 : index
    %338 = memref.load %arg1[%c31] : memref<98xf32, #tpu.memory_space<smem>>
    %c80 = arith.constant 80 : index
    %339 = memref.load %arg1[%c80] : memref<98xf32, #tpu.memory_space<smem>>
    %340 = vector.broadcast %338 : f32 to vector<1x256xf32>
    %341 = arith.mulf %340, %34 : vector<1x256xf32>
    %342 = vector.broadcast %339 : f32 to vector<1x256xf32>
    %343 = arith.mulf %342, %35 : vector<1x256xf32>
    %344 = arith.addf %341, %343 : vector<1x256xf32>
    %345 = arith.addf %337, %344 : vector<1x256xf32>
    %c32 = arith.constant 32 : index
    %346 = memref.load %arg1[%c32] : memref<98xf32, #tpu.memory_space<smem>>
    %c81 = arith.constant 81 : index
    %347 = memref.load %arg1[%c81] : memref<98xf32, #tpu.memory_space<smem>>
    %348 = vector.broadcast %346 : f32 to vector<1x256xf32>
    %349 = arith.mulf %348, %40 : vector<1x256xf32>
    %350 = vector.broadcast %347 : f32 to vector<1x256xf32>
    %351 = arith.mulf %350, %44 : vector<1x256xf32>
    %352 = arith.addf %349, %351 : vector<1x256xf32>
    %353 = arith.addf %345, %352 : vector<1x256xf32>
    %c33 = arith.constant 33 : index
    %354 = memref.load %arg1[%c33] : memref<98xf32, #tpu.memory_space<smem>>
    %c82 = arith.constant 82 : index
    %355 = memref.load %arg1[%c82] : memref<98xf32, #tpu.memory_space<smem>>
    %356 = vector.broadcast %354 : f32 to vector<1x256xf32>
    %357 = arith.mulf %356, %49 : vector<1x256xf32>
    %358 = vector.broadcast %355 : f32 to vector<1x256xf32>
    %359 = arith.mulf %358, %53 : vector<1x256xf32>
    %360 = arith.addf %357, %359 : vector<1x256xf32>
    %361 = arith.addf %353, %360 : vector<1x256xf32>
    %c34 = arith.constant 34 : index
    %362 = memref.load %arg1[%c34] : memref<98xf32, #tpu.memory_space<smem>>
    %c83 = arith.constant 83 : index
    %363 = memref.load %arg1[%c83] : memref<98xf32, #tpu.memory_space<smem>>
    %364 = vector.broadcast %362 : f32 to vector<1x256xf32>
    %365 = arith.mulf %364, %58 : vector<1x256xf32>
    %366 = vector.broadcast %363 : f32 to vector<1x256xf32>
    %367 = arith.mulf %366, %62 : vector<1x256xf32>
    %368 = arith.addf %365, %367 : vector<1x256xf32>
    %369 = arith.addf %361, %368 : vector<1x256xf32>
    %c11_32 = arith.constant 11 : index
    %c0_33 = arith.constant 0 : index
    %370 = vector.load %arg3[%c11_32, %c0_33] : memref<14x256xf32, #tpu.memory_space<vmem>>, vector<1x256xf32>
    %371 = vector.extract_strided_slice %369 {offsets = [0, 16], sizes = [1, 240], strides = [1, 1]} : vector<1x256xf32> to vector<1x240xf32>
    %372 = vector.extract_strided_slice %369 {offsets = [0, 0], sizes = [1, 16], strides = [1, 1]} : vector<1x256xf32> to vector<1x16xf32>
    %373 = tpu.concatenate %371, %372 in 1 : vector<1x240xf32>, vector<1x16xf32> -> vector<1x256xf32>
    %374 = arith.mulf %370, %373 : vector<1x256xf32>
    %375 = arith.addf %312, %374 : vector<1x256xf32>
    %cst_34 = arith.constant 0.000000e+00 : f32
    %376 = vector.broadcast %cst_34 : f32 to vector<1x256xf32>
    %c35 = arith.constant 35 : index
    %377 = memref.load %arg1[%c35] : memref<98xf32, #tpu.memory_space<smem>>
    %c84 = arith.constant 84 : index
    %378 = memref.load %arg1[%c84] : memref<98xf32, #tpu.memory_space<smem>>
    %379 = vector.broadcast %377 : f32 to vector<1x256xf32>
    %380 = arith.mulf %379, %10 : vector<1x256xf32>
    %381 = vector.broadcast %378 : f32 to vector<1x256xf32>
    %382 = arith.mulf %381, %14 : vector<1x256xf32>
    %383 = arith.addf %380, %382 : vector<1x256xf32>
    %384 = arith.addf %376, %383 : vector<1x256xf32>
    %c36 = arith.constant 36 : index
    %385 = memref.load %arg1[%c36] : memref<98xf32, #tpu.memory_space<smem>>
    %c85 = arith.constant 85 : index
    %386 = memref.load %arg1[%c85] : memref<98xf32, #tpu.memory_space<smem>>
    %387 = vector.broadcast %385 : f32 to vector<1x256xf32>
    %388 = arith.mulf %387, %19 : vector<1x256xf32>
    %389 = vector.broadcast %386 : f32 to vector<1x256xf32>
    %390 = arith.mulf %389, %23 : vector<1x256xf32>
    %391 = arith.addf %388, %390 : vector<1x256xf32>
    %392 = arith.addf %384, %391 : vector<1x256xf32>
    %c37 = arith.constant 37 : index
    %393 = memref.load %arg1[%c37] : memref<98xf32, #tpu.memory_space<smem>>
    %c86 = arith.constant 86 : index
    %394 = memref.load %arg1[%c86] : memref<98xf32, #tpu.memory_space<smem>>
    %395 = vector.broadcast %393 : f32 to vector<1x256xf32>
    %396 = arith.mulf %395, %28 : vector<1x256xf32>
    %397 = vector.broadcast %394 : f32 to vector<1x256xf32>
    %398 = arith.mulf %397, %32 : vector<1x256xf32>
    %399 = arith.addf %396, %398 : vector<1x256xf32>
    %400 = arith.addf %392, %399 : vector<1x256xf32>
    %c38 = arith.constant 38 : index
    %401 = memref.load %arg1[%c38] : memref<98xf32, #tpu.memory_space<smem>>
    %c87 = arith.constant 87 : index
    %402 = memref.load %arg1[%c87] : memref<98xf32, #tpu.memory_space<smem>>
    %403 = vector.broadcast %401 : f32 to vector<1x256xf32>
    %404 = arith.mulf %403, %34 : vector<1x256xf32>
    %405 = vector.broadcast %402 : f32 to vector<1x256xf32>
    %406 = arith.mulf %405, %35 : vector<1x256xf32>
    %407 = arith.addf %404, %406 : vector<1x256xf32>
    %408 = arith.addf %400, %407 : vector<1x256xf32>
    %c39 = arith.constant 39 : index
    %409 = memref.load %arg1[%c39] : memref<98xf32, #tpu.memory_space<smem>>
    %c88 = arith.constant 88 : index
    %410 = memref.load %arg1[%c88] : memref<98xf32, #tpu.memory_space<smem>>
    %411 = vector.broadcast %409 : f32 to vector<1x256xf32>
    %412 = arith.mulf %411, %40 : vector<1x256xf32>
    %413 = vector.broadcast %410 : f32 to vector<1x256xf32>
    %414 = arith.mulf %413, %44 : vector<1x256xf32>
    %415 = arith.addf %412, %414 : vector<1x256xf32>
    %416 = arith.addf %408, %415 : vector<1x256xf32>
    %c40 = arith.constant 40 : index
    %417 = memref.load %arg1[%c40] : memref<98xf32, #tpu.memory_space<smem>>
    %c89 = arith.constant 89 : index
    %418 = memref.load %arg1[%c89] : memref<98xf32, #tpu.memory_space<smem>>
    %419 = vector.broadcast %417 : f32 to vector<1x256xf32>
    %420 = arith.mulf %419, %49 : vector<1x256xf32>
    %421 = vector.broadcast %418 : f32 to vector<1x256xf32>
    %422 = arith.mulf %421, %53 : vector<1x256xf32>
    %423 = arith.addf %420, %422 : vector<1x256xf32>
    %424 = arith.addf %416, %423 : vector<1x256xf32>
    %c41 = arith.constant 41 : index
    %425 = memref.load %arg1[%c41] : memref<98xf32, #tpu.memory_space<smem>>
    %c90 = arith.constant 90 : index
    %426 = memref.load %arg1[%c90] : memref<98xf32, #tpu.memory_space<smem>>
    %427 = vector.broadcast %425 : f32 to vector<1x256xf32>
    %428 = arith.mulf %427, %58 : vector<1x256xf32>
    %429 = vector.broadcast %426 : f32 to vector<1x256xf32>
    %430 = arith.mulf %429, %62 : vector<1x256xf32>
    %431 = arith.addf %428, %430 : vector<1x256xf32>
    %432 = arith.addf %424, %431 : vector<1x256xf32>
    %c12_35 = arith.constant 12 : index
    %c0_36 = arith.constant 0 : index
    %433 = vector.load %arg3[%c12_35, %c0_36] : memref<14x256xf32, #tpu.memory_space<vmem>>, vector<1x256xf32>
    %434 = vector.extract_strided_slice %432 {offsets = [0, 32], sizes = [1, 224], strides = [1, 1]} : vector<1x256xf32> to vector<1x224xf32>
    %435 = vector.extract_strided_slice %432 {offsets = [0, 0], sizes = [1, 32], strides = [1, 1]} : vector<1x256xf32> to vector<1x32xf32>
    %436 = tpu.concatenate %434, %435 in 1 : vector<1x224xf32>, vector<1x32xf32> -> vector<1x256xf32>
    %437 = arith.mulf %433, %436 : vector<1x256xf32>
    %438 = arith.addf %375, %437 : vector<1x256xf32>
    %cst_37 = arith.constant 0.000000e+00 : f32
    %439 = vector.broadcast %cst_37 : f32 to vector<1x256xf32>
    %c42 = arith.constant 42 : index
    %440 = memref.load %arg1[%c42] : memref<98xf32, #tpu.memory_space<smem>>
    %c91 = arith.constant 91 : index
    %441 = memref.load %arg1[%c91] : memref<98xf32, #tpu.memory_space<smem>>
    %442 = vector.broadcast %440 : f32 to vector<1x256xf32>
    %443 = arith.mulf %442, %10 : vector<1x256xf32>
    %444 = vector.broadcast %441 : f32 to vector<1x256xf32>
    %445 = arith.mulf %444, %14 : vector<1x256xf32>
    %446 = arith.addf %443, %445 : vector<1x256xf32>
    %447 = arith.addf %439, %446 : vector<1x256xf32>
    %c43 = arith.constant 43 : index
    %448 = memref.load %arg1[%c43] : memref<98xf32, #tpu.memory_space<smem>>
    %c92 = arith.constant 92 : index
    %449 = memref.load %arg1[%c92] : memref<98xf32, #tpu.memory_space<smem>>
    %450 = vector.broadcast %448 : f32 to vector<1x256xf32>
    %451 = arith.mulf %450, %19 : vector<1x256xf32>
    %452 = vector.broadcast %449 : f32 to vector<1x256xf32>
    %453 = arith.mulf %452, %23 : vector<1x256xf32>
    %454 = arith.addf %451, %453 : vector<1x256xf32>
    %455 = arith.addf %447, %454 : vector<1x256xf32>
    %c44 = arith.constant 44 : index
    %456 = memref.load %arg1[%c44] : memref<98xf32, #tpu.memory_space<smem>>
    %c93 = arith.constant 93 : index
    %457 = memref.load %arg1[%c93] : memref<98xf32, #tpu.memory_space<smem>>
    %458 = vector.broadcast %456 : f32 to vector<1x256xf32>
    %459 = arith.mulf %458, %28 : vector<1x256xf32>
    %460 = vector.broadcast %457 : f32 to vector<1x256xf32>
    %461 = arith.mulf %460, %32 : vector<1x256xf32>
    %462 = arith.addf %459, %461 : vector<1x256xf32>
    %463 = arith.addf %455, %462 : vector<1x256xf32>
    %c45 = arith.constant 45 : index
    %464 = memref.load %arg1[%c45] : memref<98xf32, #tpu.memory_space<smem>>
    %c94 = arith.constant 94 : index
    %465 = memref.load %arg1[%c94] : memref<98xf32, #tpu.memory_space<smem>>
    %466 = vector.broadcast %464 : f32 to vector<1x256xf32>
    %467 = arith.mulf %466, %34 : vector<1x256xf32>
    %468 = vector.broadcast %465 : f32 to vector<1x256xf32>
    %469 = arith.mulf %468, %35 : vector<1x256xf32>
    %470 = arith.addf %467, %469 : vector<1x256xf32>
    %471 = arith.addf %463, %470 : vector<1x256xf32>
    %c46 = arith.constant 46 : index
    %472 = memref.load %arg1[%c46] : memref<98xf32, #tpu.memory_space<smem>>
    %c95 = arith.constant 95 : index
    %473 = memref.load %arg1[%c95] : memref<98xf32, #tpu.memory_space<smem>>
    %474 = vector.broadcast %472 : f32 to vector<1x256xf32>
    %475 = arith.mulf %474, %40 : vector<1x256xf32>
    %476 = vector.broadcast %473 : f32 to vector<1x256xf32>
    %477 = arith.mulf %476, %44 : vector<1x256xf32>
    %478 = arith.addf %475, %477 : vector<1x256xf32>
    %479 = arith.addf %471, %478 : vector<1x256xf32>
    %c47 = arith.constant 47 : index
    %480 = memref.load %arg1[%c47] : memref<98xf32, #tpu.memory_space<smem>>
    %c96 = arith.constant 96 : index
    %481 = memref.load %arg1[%c96] : memref<98xf32, #tpu.memory_space<smem>>
    %482 = vector.broadcast %480 : f32 to vector<1x256xf32>
    %483 = arith.mulf %482, %49 : vector<1x256xf32>
    %484 = vector.broadcast %481 : f32 to vector<1x256xf32>
    %485 = arith.mulf %484, %53 : vector<1x256xf32>
    %486 = arith.addf %483, %485 : vector<1x256xf32>
    %487 = arith.addf %479, %486 : vector<1x256xf32>
    %c48 = arith.constant 48 : index
    %488 = memref.load %arg1[%c48] : memref<98xf32, #tpu.memory_space<smem>>
    %c97 = arith.constant 97 : index
    %489 = memref.load %arg1[%c97] : memref<98xf32, #tpu.memory_space<smem>>
    %490 = vector.broadcast %488 : f32 to vector<1x256xf32>
    %491 = arith.mulf %490, %58 : vector<1x256xf32>
    %492 = vector.broadcast %489 : f32 to vector<1x256xf32>
    %493 = arith.mulf %492, %62 : vector<1x256xf32>
    %494 = arith.addf %491, %493 : vector<1x256xf32>
    %495 = arith.addf %487, %494 : vector<1x256xf32>
    %c13_38 = arith.constant 13 : index
    %c0_39 = arith.constant 0 : index
    %496 = vector.load %arg3[%c13_38, %c0_39] : memref<14x256xf32, #tpu.memory_space<vmem>>, vector<1x256xf32>
    %497 = vector.extract_strided_slice %495 {offsets = [0, 48], sizes = [1, 208], strides = [1, 1]} : vector<1x256xf32> to vector<1x208xf32>
    %498 = vector.extract_strided_slice %495 {offsets = [0, 0], sizes = [1, 48], strides = [1, 1]} : vector<1x256xf32> to vector<1x48xf32>
    %499 = tpu.concatenate %497, %498 in 1 : vector<1x208xf32>, vector<1x48xf32> -> vector<1x256xf32>
    %500 = arith.mulf %496, %499 : vector<1x256xf32>
    %501 = arith.addf %438, %500 : vector<1x256xf32>
    %502 = arith.negf %501 : vector<1x256xf32>
    %503 = math.exp %502 : vector<1x256xf32>
    %cst_40 = arith.constant 1.000000e+00 : f32
    %504 = vector.broadcast %cst_40 : f32 to vector<1x256xf32>
    %505 = arith.addf %504, %503 : vector<1x256xf32>
    %506 = arith.divf %504, %505 : vector<1x256xf32>
    %507 = vector.broadcast %506 : vector<1x256xf32> to vector<4x256xf32>
    %508 = arith.mulf %1, %507 : vector<4x256xf32>
    %c0_41 = arith.constant 0 : index
    %c0_42 = arith.constant 0 : index
    %c0_43 = arith.constant 0 : index
    %509 = vector.load %arg4[%c0_41, %c0_42, %c0_43] : memref<1x4x256xf32, #tpu.memory_space<vmem>>, vector<1x4x256xf32>
    %510 = vector.shape_cast %509 : vector<1x4x256xf32> to vector<4x256xf32>
    %511 = vector.shape_cast %508 : vector<4x256xf32> to vector<1x4x256xf32>
    tpu.vector_store %arg4[%c0_41, %c0_42, %c0_43], %511 {strides = array<i32>} : memref<1x4x256xf32, #tpu.memory_space<vmem>>, vector<1x4x256xf32>,
    return
  }
  func.func @transform_0(%arg0: i32) -> i32 {
    %c0_i32 = arith.constant 0 : i32
    %c0_i32_0 = arith.constant 0 : i32
    return %c0_i32 : i32
  }
  func.func @transform_1(%arg0: i32) -> (i32, i32, i32) {
    %c0_i32 = arith.constant 0 : i32
    %c0_i32_0 = arith.constant 0 : i32
    %c0_i32_1 = arith.constant 0 : i32
    return %arg0, %c0_i32, %c0_i32_0 : i32, i32, i32
  }
  func.func @transform_2(%arg0: i32) -> (i32, i32) {
    %c0_i32 = arith.constant 0 : i32
    %c0_i32_0 = arith.constant 0 : i32
    %c0_i32_1 = arith.constant 0 : i32
    return %c0_i32, %c0_i32_0 : i32, i32
  }
  func.func @transform_3(%arg0: i32) -> (i32, i32, i32) {
    %c0_i32 = arith.constant 0 : i32
    %c0_i32_0 = arith.constant 0 : i32
    %c0_i32_1 = arith.constant 0 : i32
    return %arg0, %c0_i32, %c0_i32_0 : i32, i32, i32
  }
}

</mosaic_0001>

<bundles_post_ra>
// kernel: sam_forward.1
= control target key start
LH: loop header
LB: loop body
LE: loop exit
PB: predicated region body
PF: predicated region fallthrough
CT: control target
= control target key end

     0   :  { %s2058_s0 = inlined_call_operand.vmem [shape: f32[98], index: 0, kind: input, shape index: {}]   ;;  %s2059_s1 = inlined_call_operand.vmem [shape: f32[2,4,256], index: 1, kind: input, shape index: {}]   ;;  %s2060_s2 = inlined_call_operand.vmem [shape: f32[14,256], index: 2, kind: input, shape index: {}]   ;;  %s2061_s3 = inlined_call_operand.vmem [shape: f32[2,4,256], index: 3, kind: output, shape index: {}]  }
   0x1   :  { %2096 = sst [smem:[#allocation35_spill]] %s2058_s0 }
   0x2   :  { %2097 = sst [smem:[#allocation36_spill]] %s2059_s1 }
   0x3   :  { %2098 = sst [smem:[#allocation37_spill]] %s2061_s3 }
   0x4   :  { %8 = vsyncpa [#allocation3], 0  ;;  %s1245_s12 = smov 0  }
   0x5 LB: > { %2099 = sst [smem:[#allocation5_spill]] %s1210_s12  ;;  %s1024_s13 = sadd.s32 4294967295, %s1210_s12   ;;  %s1210_s12 = sphi %s1245_s12, %s14_s12  }
   0x6   : > { %p1026_p0 = scmp.ge.s32.totalorder %s1210_s12, 1  ;;  %p113_p1 = scmp.lt.s32.totalorder %s1210_s12, 3 }
   0x7   : > { %s2100_s0 = sld [smem:[#allocation35_spill]]  ;;  %p1158_p3 = scmp.eq.s32.totalorder %s1024_s13, 0 }
   0x8   : > { %p114_p2 = pnand %p1026_p0, %p113_p1  ;;  %s1212_s17 = smov [#allocation2]  }
   0xa   : > { %p1154_p4 = pneg %p114_p2  ;;  %149 = sbr.rel (%p114_p2) target bundleno = 422 (0x1a6), region = 32 }
   0xc   : > { %p1155_p5 = pnand %p1158_p3, %p1154_p4 }
   0xd   : > { %s125_s16 = sshll.u32 %s2100_s0, 4  ;;  %s126_s16 = int_to_ptr.vmem [resolvable:$true] %s125_s16 }
   0xe   : > { %1157 = dma.vmem_to_smem (!%p1155_p5), %s126_s16, 16, %s1212_s17, [#allocation3]  }
   0xf   : > { %1205 = dma.done.wait (%p1158_p3), [#allocation3], 16  }
  0x10   : > { %1207 = vsyncadd (%p1158_p3), [#allocation3], 4294967280 }
  0x11   : > { %156 = sfence }
  0x12   : > { %p175_p6 = scmp.lt.s32.totalorder %s1024_s13, 1  ;;  %s2102_s1 = sld [smem:[#allocation36_spill]]  ;;  %vm192_vm0 = vcmask 1043456   ;;  %vm266_vm1 = vcmask 15360   ;;  %vm240_vm2 = vcmask 1040384   ;;  %vm234_vm3 = vcmask 23552  }
  0x13   : > { %s1213_s22 = smov 127   ;;  %s1214_s23 = smov 3   ;;  %v1381_v38 = vld [vmem:[%s2060_s2 + $0x1] ss:$8 sm:$0x3]  ;;  %vm295_vm4 = vcmask 7168  }
  0x14   : > { %s2197_s13 = smov (!%p175_p6, %s1024_s13), 1  ;;  %s1215_s24 = smov 2   ;;  %vm333_vm5 = vcmask 1039360   ;;  %vm362_vm6 = vcmask 1031168   ;;  %vm391_vm7 = vcmask 1022976   ;;  %vm480_vm8 = vcmask 392192  }
  0x15   : > { %2101 = sst [smem:[#allocation6_spill]] %s2197_s13  ;;  %s2062_s18 = sshll.u32 %s2197_s13, 3  ;;  %vm556_vm9 = vcmask 261120   ;;  %vm632_vm10 = vcmask 130048   ;;  %vm767_vm11 = vcmask 916480   ;;  %vm919_vm12 = vcmask 654336  }
  0x16   : > { %s1216_s25 = smov 1   ;;  %s1217_s26 = smov 126   ;;  %vm843_vm13 = vcmask 785408  }
  0x17   : > { %s1218_s27 = smov 125   ;;  %s1308_s28 = sld [smem:[#allocation2 + $0x8]] }
  0x18   : > { %s179_s21 = scalar_lea.vmem %s2102_s1, %s2062_s18  ;;  %s1310_s29 = sld [smem:[#allocation2 + $0x1]] }
  0x19   : > { %v1264_v0 = vld [vmem:[%s179_s21] sm:$0xff]  ;;  %s1312_s30 = sld [smem:[#allocation2 + $0xf]] }
  0x1a   : > { %187 = vst [vmem:[#allocation1] ss:$2 sm:$0xff] %v1264_v0  ;;  %s1314_s4 = sld [smem:[#allocation2 + $0x24]] }
  0x1b   : > { %s1316_s5 = sld [smem:[#allocation2 + $0x1d]] }
  0x1c   : > { %s1318_s6 = sld [smem:[#allocation2 + $0x7]] }
  0x1d   : > { %s1320_s7 = sld [smem:[#allocation2]]  ;;  %v500_v43 = vstv %s1308_s28 }
  0x1e   : > { %s1322_s8 = sld [smem:[#allocation2 + $0xe]]  ;;  %v424_v44 = vstv %s1310_s29 }
  0x1f   : > { %s1324_s9 = sld [smem:[#allocation2 + $0x23]]  ;;  %v576_v46 = vstv %s1312_s30 }
  0x20   : > { %s1326_s10 = sld [smem:[#allocation2 + $0x1c]]  ;;  %v788_v47 = vstv %s1314_s4 }
  0x21   : > { %v189_v1 = vld.sshfl [vmem:[#allocation1 + $0x8] sm:$0xff pattern:$0x75316420]  ;;  %v188_v2 = vld.sshfl [vmem:[#allocation1] sm:$0xff pattern:$0x75316420]  ;;  %v712_v48 = vstv %s1316_s5 }
  0x22   : > { %v200_v3 = vsel %vm192_vm0, %v189_v1, 0.0  ;;  %207 = vst [vmem:[#allocation1] ss:$2 sm:$0xff] %v1264_v0  ;;  %v193_v4 = vsel %vm192_vm0, %v188_v2, 0.0  ;;  %s1328_s11 = sld [smem:[#allocation2 + $0x38]]  ;;  %v492_v49 = vstv %s1318_s6 }
  0x23   : > { %v201_v5 = vrot.slane %v200_v3, 4  ;;  %v194_v6 = vrot.slane %v193_v4, 4  ;;  %s1330_s14 = sld [smem:[#allocation2 + $0x9]]  ;;  %v416_v50 = vstv %s1320_s7 }
  0x24   : > { %s1332_s15 = sld [smem:[#allocation2 + $0x31]]  ;;  %v568_v51 = vstv %s1322_s8 }
  0x25   : > { %v202_v7 = vadd.f32 %v201_v5, %v200_v3  ;;  %v195_v8 = vadd.f32 %v194_v6, %v193_v4  ;;  %2103 = sst [smem:[#allocation7_spill]] %s1324_s9  ;;  %v780_v52 = vstv %s1324_s9 }
  0x26   : > { %2104 = sst [smem:[#allocation8_spill]] %s1326_s10  ;;  %v704_v56 = vstv %s1326_s10 }
  0x27   : > { %v203_v9 = vrot.slane %v202_v7, 2  ;;  %v196_v10 = vrot.slane %v195_v8, 2  ;;  %s1334_s16 = sld [smem:[#allocation2 + $0x2]] }
  0x28   : > { %2105 = sst [smem:[#allocation9_spill]] %s1328_s11  ;;  %v494_v53 = vstv %s1328_s11 }
  0x29   : > { %v204_v11 = vadd.f32 %v203_v9, %v202_v7  ;;  %v209_v12 = vld.sshfl [vmem:[#allocation1 + $0x8] sm:$0xff pattern:$0x75316420]  ;;  %v208_v13 = vld.sshfl [vmem:[#allocation1] sm:$0xff pattern:$0x75316420]  ;;  %v197_v18 = vadd.f32 %v196_v10, %v195_v8  ;;  %v508_v54 = vstv %s1330_s14 }
  0x2a   : > { %v219_v14 = vsel %vm192_vm0, %v209_v12, -inf  ;;  %v212_v15 = vsel %vm192_vm0, %v208_v13, -inf  ;;  %2106 = sst [smem:[#allocation10_spill]] %s1330_s14  ;;  %v418_v55 = vstv %s1332_s15  ;;  %v1037_v9 = vld [vmem:[%s2060_s2 + $0x3] ss:$8 sm:$0x3] }
  0x2b   : > { %v205_v16 = vrot.slane %v204_v11, 1  ;;  %v220_v17 = vrot.slane %v219_v14, 4  ;;  %v213_v19 = vrot.slane %v212_v15, 4  ;;  %v198_v24 = vrot.slane %v197_v18, 1  ;;  %2107 = sst [smem:[#allocation11_spill]] %s1332_s15 }
  0x2c   : > { %s1336_s17 = sld [smem:[#allocation2 + $0x3f]] }
  0x2d   : > { %v1272_v20 = vadd.f32 %v205_v16, %v204_v11  ;;  %v221_v21 = vmax.f32 %v219_v14, %v220_v17  ;;  %v214_v22 = vmax.f32 %v212_v15, %v213_v19  ;;  %v1278_v28 = vadd.f32 %v198_v24, %v197_v18  ;;  %2108 = sst [smem:[#allocation12_spill]] %s1334_s16 }
  0x2e   : > { %s1338_s19 = sld [smem:[#allocation2 + $0x10]]  ;;  %v432_v61 = vstv %s1334_s16 }
  0x2f   : > { %331 = vrot.lane.b32.xlu1 %v1272_v20, %s1213_s22  ;;  %228 = vrot.lane.b32.xlu0 %v1272_v20, %s1214_s23  ;;  %v222_v23 = vrot.slane %v221_v21, 2  ;;  %v215_v25 = vrot.slane %v214_v22, 2  ;;  %s1340_s20 = sld [smem:[#allocation2 + $0x54]]  ;;  %v319_v57 = vrot.slane %v1272_v20, 7 }
  0x30   : > { %261 = vrot.lane.b32.xlu2 %v1272_v20, %s1215_s24  ;;  %s1342_s21 = sld [smem:[#allocation2 + $0x25]] }
  0x31   : > { %v223_v26 = vmax.f32 %v221_v21, %v222_v23  ;;  %v216_v29 = vmax.f32 %v214_v22, %v215_v25  ;;  %s1356_s18 = sld [smem:[#allocation2 + $0x27]]  ;;  %v320_v4 = vsel %vm240_vm2, %v1278_v28, %v319_v57  ;;  %v226_v21 = vld [vmem:[%s2060_s2] ss:$8 sm:$0x3] }
  0x32   : > { %2109 = sst [smem:[#allocation13_spill]] %s1336_s17  ;;  %v570_v62 = vstv %s1336_s17  ;;  %v1459_v14 = vmul.f32 %v1037_v9, %v320_v4 }
  0x33   : > { %v224_v27 = vrot.slane %v223_v26, 1  ;;  %v217_v31 = vrot.slane %v216_v29, 1  ;;  %s1358_s0 = sld [smem:[#allocation2 + $0x5b]] }
  0x34   : > { %2110 = sst [smem:[#allocation14_spill]] %s1338_s19  ;;  %v584_v1 = vstv %s1338_s19 }
  0x35   : > { %v1280_v30 = vmax.f32 %v223_v26, %v224_v27  ;;  %v1285_v32 = vmax.f32 %v216_v29, %v217_v31  ;;  %2111 = sst [smem:[#allocation15_spill]] %s1340_s20  ;;  %v782_v6 = vstv %s1340_s20 }
  0x36   : > { %2112 = sst [smem:[#allocation16_spill]] %s1342_s21  ;;  %v796_v10 = vstv %s1342_s21 }
  0x37   : > { %245 = vrot.lane.b32.xlu1 %v1280_v30, %s1214_s23  ;;  %232 = vrot.lane.b32.xlu0 %v1278_v28, %s1214_s23  ;;  %2117 = sst [smem:[#allocation21_spill]] %s1356_s18  ;;  %v323_v58 = vrot.slane %v1280_v30, 7 }
  0x38   : > { %264 = vrot.lane.b32.xlu2 %v1278_v28, %s1215_s24  ;;  %s1360_s1 = sld [smem:[#allocation2 + $0x39]] }
  0x39   : > { %2118 = sst [smem:[#allocation22_spill]] %s1358_s0  ;;  %v324_v5 = vsel %vm240_vm2, %v1285_v32, %v323_v58 }
  0x3a   : > { %s1363_s12 = sld [smem:[#allocation2 + $0x3a]]  ;;  %v1461_v15 = vmul.f32 %v1037_v9, %v324_v5 }
  0x3b   : > { %s1365_s3 = sld [smem:[#allocation2 + $0x32]] }
  0x3c   : > { %s1367_s13 = sld [smem:[#allocation2 + $0x33]] }
  0x3d   : > { %s1372_s18 = sld [smem:[#allocation2 + $0xa]] }
  0x3e   : > { %2119 = sst [smem:[#allocation23_spill]] %s1360_s1 }
  0x3f   : > { %249 = vrot.lane.b32.xlu1 %v1285_v32, %s1214_s23  ;;  %293 = vrot.lane.b32.xlu0 %v1278_v28, %s1216_s25  ;;  %s1346_s23 = sld [smem:[#allocation2 + $0xb]] }
  0x40   : > { %290 = vrot.lane.b32.xlu2 %v1272_v20, %s1216_s25  ;;  %2120 = sst [smem:[#allocation24_spill]] %s1363_s12 }
  0x41   : > { %s1374_s0 = sld [smem:[#allocation2 + $0x3b]]  ;;  %v426_v29 = vstv %s1365_s3 }
  0x42   : > { %2121 = sst [smem:[#allocation25_spill]] %s1367_s13 }
  0x43   : > { %s1376_s1 = sld [smem:[#allocation2 + $0x3]]  ;;  %v516_v18 = vstv %s1372_s18 }
  0x44   : > { %s1388_s13 = sld [smem:[#allocation2 + $0x3c]]  ;;  %v517_v31 = vmul.f32 %v516_v18, %v1459_v14 }
  0x45   : > { %s1397_s12 = sld [smem:[#allocation2 + $0x35]] }
  0x46   : > { %s1415_s28 = sld [smem:[#allocation2 + $0x11]] }
  0x47   : > { %278 = vrot.lane.b32.xlu1 %v1285_v32, %s1215_s24  ;;  %329 = vrot.lane.b32.xlu0 %v1278_v28, %s1213_s22  ;;  %s1426_s29 = sld [smem:[#allocation2 + $0x42]]  ;;  %v518_v19 = vstv %s1374_s0 }
  0x48   : > { %307 = vrot.lane.b32.xlu2 %v1285_v32, %s1216_s25  ;;  %s1434_s30 = sld [smem:[#allocation2 + $0x55]] }
  0x49   : > { %2123 = sst [smem:[#allocation27_spill]] %s1376_s1 }
  0x4a   : > { %2124 = sst [smem:[#allocation28_spill]] %s1388_s13 }
  0x4b   : > { %s1390_s1 = sld [smem:[#allocation2 + $0xc]] }
  0x4c   : > { %2126 = sst [smem:[#allocation30_spill]] %s1397_s12 }
  0x4d   : > { %s1446_s4 = sld [smem:[#allocation2 + $0x56]]  ;;  %v594_v4 = vstv %s1426_s29 }
  0x4e   : > { %s1452_s16 = sld [smem:[#allocation2 + $0x43]] }
  0x4f   : > { %304 = vrot.lane.b32.xlu1 %v1280_v30, %s1216_s25  ;;  %275 = vrot.lane.b32.xlu0 %v1280_v30, %s1215_s24  ;;  %s1348_s24 = sld [smem:[#allocation2 + $0x4]] }
  0x50   : > { %343 = vrot.lane.b32.xlu2 %v1285_v32, %s1213_s22  ;;  %s1350_s25 = sld [smem:[#allocation2 + $0x12]] }
  0x51   : > { %2125 = sst [smem:[#allocation29_spill]] %s1390_s1 }
  0x52   : > { %s1409_s1 = sld [smem:[#allocation2 + $0x41]] }
  0x53   : > { %2129 = sst [smem:[#allocation33_spill]] %s1446_s4 }
  0x54   : > { %2130 = sst [smem:[#allocation34_spill]] %s1452_s16 }
  0x55   : > { %s2133_s10 = sld [smem:[#allocation23_spill]]  ;;  %v448_v23 = vstv %s1348_s24 }
  0x56   : > { %2114 = sst [smem:[#allocation18_spill]] %s1350_s25 }
  0x57   : > { %358 = vrot.lane.b32.xlu1 %v1278_v28, %s1217_s26  ;;  %345 = vrot.lane.b32.xlu0 %v1280_v30, %s1213_s22  ;;  %s1344_s22 = sld [smem:[#allocation2 + $0x4d]] }
  0x58   : > { %360 = vrot.lane.b32.xlu2 %v1272_v20, %s1217_s26  ;;  %s1401_s25 = sld [smem:[#allocation2 + $0x5]] }
  0x59   : > { %2128 = sst [smem:[#allocation32_spill]] %s1409_s1 }
  0x5a   : > { %s2131_s14 = sld [smem:[#allocation18_spill]] }
  0x5b   : > { %s2134_s17 = sld [smem:[#allocation24_spill]]  ;;  %v502_v27 = vstv %s2133_s10 }
  0x5c   : > { %s1463_s15 = sld [smem:[#allocation2 + $0x3d]] }
  0x5d   : > { %2113 = sst [smem:[#allocation17_spill]] %s1344_s22  ;;  %v706_v11 = vstv %s1344_s22 }
  0x5e   : > { %2127 = sst [smem:[#allocation31_spill]] %s1401_s25 }
  0x5f   : > { %374 = vrot.lane.b32.xlu1 %v1280_v30, %s1217_s26  ;;  %372 = vrot.lane.b32.xlu0 %v1285_v32, %s1217_s26  ;;  %s1352_s26 = sld [smem:[#allocation2 + $0x2a]] }
  0x60   : > { %387 = vrot.lane.b32.xlu2 %v1278_v28, %s1218_s27  ;;  %s2136_s19 = sld [smem:[#allocation21_spill]]  ;;  %v600_v24 = vstv %s2131_s14 }
  0x61   : > { %s1470_s5 = sld [smem:[#allocation2 + $0x36]]  ;;  %v510_v28 = vstv %s2134_s17 }
  0x62   : > { %2135 = sst [smem:[#allocation18_spill]] %s1463_s15 }
  0x63   : > { %s2137_s11 = sld [smem:[#allocation25_spill]] }
  0x64   : > { %s2138_s9 = sld [smem:[#allocation27_spill]] }
  0x65   : > { %2115 = sst [smem:[#allocation19_spill]] %s1352_s26 }
  0x66   : > { %s1478_s26 = sld [smem:[#allocation2 + $0x26]] }
  0x67   : > { %401 = vrot.lane.b32.xlu1 %v1285_v32, %s1218_s27  ;;  %389 = vrot.lane.b32.xlu0 %v1272_v20, %s1218_s27  ;;  %v524_v20 = vstv %s1346_s23  ;;  %s1486_s0 = sld [smem:[#allocation2 + $0x57]]  ;;  %v519_v32 = vmul.f32 %v518_v19, %v1461_v15 }
  0x68   : > { %403 = vrot.lane.b32.xlu2 %v1280_v30, %s1218_s27  ;;  %s1354_s27 = sld [smem:[#allocation2 + $0x1e]]  ;;  %v812_v30 = vstv %s2136_s19  ;;  %s1220_s19 = smov 48  }
  0x69   : > { %s2140_s18 = sld [smem:[#allocation22_spill]]  ;;  %v1516_v9 = vadd.f32 %v519_v32, %v517_v31  ;;  %v1535_v32 = vld [vmem:[%s2060_s2 + $0x2] ss:$8 sm:$0x3] }
  0x6a   : > { %s1493_s21 = sld [smem:[#allocation2 + $0x13]] }
  0x6b   : > { %s1500_s22 = sld [smem:[#allocation2 + $0x44]] }
  0x6c   : > { %s1505_s17 = sld [smem:[#allocation2 + $0x58]] }
  0x6d   : > { %s1529_s29 = sld [smem:[#allocation2 + $0x4f]] }
  0x6e   : > { %2116 = sst [smem:[#allocation20_spill]] %s1354_s27 }
  0x6f   : > { %s1369_s27 = sld [smem:[#allocation2 + $0x40]] }
  0x70   : > { %s2132_s20 = sld [smem:[#allocation20_spill]] }
  0x71   : > { %2141 = sst [smem:[#allocation20_spill]] %s1493_s21 }
  0x72   : > { %2142 = sst [smem:[#allocation23_spill]] %s1505_s17 }
  0x73   : > { %s1539_s6 = sld [smem:[#allocation2 + $0xd]] }
  0x74   : > { %s1579_s8 = sld [smem:[#allocation2 + $0x50]] }
  0x75   : > { %2122 = sst [smem:[#allocation26_spill]] %s1369_s27 }
  0x76   : > { %s1384_s27 = sld [smem:[#allocation2 + $0x34]]  ;;  %v720_v25 = vstv %s2132_s20 }
  0x77   : > { %s2139_s15 = sld [smem:[#allocation26_spill]] }
  0x78   : > { %s2151_s21 = sld [smem:[#allocation18_spill]] }
  0x79   : > { %s1608_s17 = sld [smem:[#allocation2 + $0x6]] }
  0x7a   : > { %s1634_s7 = sld [smem:[#allocation2 + $0x14]] }
  0x7b   : > { %s1647_s16 = sld [smem:[#allocation2 + $0x45]] }
  0x7c   : > { %s1723_s23 = sld [smem:[#allocation2 + $0x52]] }
  0x7d   : > { %s1762_s10 = sld [smem:[#allocation2 + $0x2b]] }
  0x7e   : > { %s2167_s25 = sld [smem:[#allocation29_spill]] }
  0x7f   : > { %s2168_s20 = sld [smem:[#allocation31_spill]] }
  0x80   : > { %s2170_s14 = sld [smem:[#allocation20_spill]] }
  0x81   : > { %s1815_s24 = sld [smem:[#allocation2 + $0x22]] }
  0x8a   : > { %v262_v33 = vpop.permute.xlu2 %261 }
  0x92   : > { %v265_v34 = vpop.permute.xlu2 %264 }
  0x93   : > { %v267_v35 = vsel %vm266_vm1, %v265_v34, %v262_v33  ;;  %v269_v37 = vsel %vm266_vm1, %v262_v33, %v265_v34  ;;  %v434_v33 = vstv %s2137_s11  ;;  %v440_v34 = vstv %s2138_s9  ;;  %s1514_s9 = sld [smem:[#allocation2 + $0x28]] }
  0x94   : > { %v271_v36 = vrot.slane %v267_v35, 7  ;;  %s1661_s11 = sld [smem:[#allocation2 + $0x29]] }
  0x96   : > { %v272_v39 = vsel %vm240_vm2, %v269_v37, %v271_v36  ;;  %v442_v36 = vstv %s1384_s27  ;;  %v578_v37 = vstv %s2139_s15  ;;  %s1590_s27 = sld [smem:[#allocation2 + $0x20]] }
  0x97   : > { %v1393_v42 = vmul.f32 %v1381_v38, %v272_v39  ;;  %v586_v39 = vstv %s1409_s1  ;;  %s1545_s1 = sld [smem:[#allocation2 + $0x3e]] }
  0x98   : > { %s1889_s15 = sld [smem:[#allocation2 + $0x2e]] }
  0x99   : > { %v1421_v59 = vmul.f32 %v500_v43, %v1393_v42  ;;  %v1424_v60 = vmul.f32 %v424_v44, %v1393_v42  ;;  %v1431_v63 = vmul.f32 %v576_v46, %v1393_v42  ;;  %v1444_v7 = vmul.f32 %v788_v47, %v1393_v42  ;;  %2143 = sst [smem:[#allocation21_spill]] %s1514_s9 }
  0x9a   : > { %v1399_v45 = vpop.permute.xlu2 %290  ;;  %v1457_v12 = vmul.f32 %v712_v48, %v1393_v42  ;;  %v592_v44 = vstv %s1415_s28  ;;  %v790_v46 = vstv %s1434_s30  ;;  %v798_v47 = vstv %s1446_s4  ;;  %s1519_s28 = sld [smem:[#allocation2 + $0x4e]] }
  0x9b   : > { %v858_v48 = vstv %s2140_s18  ;;  %s1556_s18 = sld [smem:[#allocation2 + $0x1f]] }
  0x9c   : > { %s1599_s4 = sld [smem:[#allocation2 + $0x51]] }
  0x9d   : > { %s1624_s9 = sld [smem:[#allocation2 + $0x37]] }
  0x9e   : > { %s2172_s3 = sld [smem:[#allocation21_spill]] }
  0x9f   : > { %s1908_s30 = sld [smem:[#allocation2 + $0x2d]] }
  0xa1   : > { %v1386_v40 = vpop.permute.xlu1 %331  ;;  %v229_v41 = vpop.permute.xlu0 %228 }
  0xa2   : > { %v1481_v26 = vpop.permute.xlu2 %307 }
  0xa9   : > { %v1436_v2 = vpop.permute.xlu1 %245  ;;  %v233_v3 = vpop.permute.xlu0 %232 }
  0xaa   : > { %v235_v8 = vsel %vm234_vm3, %v233_v3, %v229_v41  ;;  %v237_v17 = vsel %vm234_vm3, %v229_v41, %v233_v3  ;;  %v441_v3 = vmul.f32 %v440_v34, %v1459_v14 }
  0xab   : > { %v239_v13 = vrot.slane %v235_v8, 7 }
  0xad   : > { %v241_v22 = vsel %vm240_vm2, %v237_v17, %v239_v13  ;;  %v443_v13 = vmul.f32 %v442_v36, %v1461_v15 }
  0xae   : > { %v1495_v35 = vmul.f32 %v241_v22, %v226_v21  ;;  %v593_v22 = vmul.f32 %v592_v44, %v1459_v14 }
  0xb0   : > { %v493_v19 = vmul.f32 %v492_v49, %v1495_v35  ;;  %v595_v49 = vmul.f32 %v594_v4, %v1461_v15  ;;  %v417_v44 = vmul.f32 %v416_v50, %v1495_v35  ;;  %v1561_v4 = vpop.permute.xlu2 %343 }
  0xb1   : > { %v250_v41 = vpop.permute.xlu1 %249  ;;  %v294_v43 = vpop.permute.xlu0 %293 }
  0xb2   : > { %v251_v57 = vsel %vm234_vm3, %v250_v41, %v1436_v2  ;;  %v296_v58 = vsel %vm295_vm4, %v294_v43, %v1399_v45  ;;  %v253_v17 = vsel %vm234_vm3, %v1436_v2, %v250_v41  ;;  %v298_v18 = vsel %vm295_vm4, %v1399_v45, %v294_v43 }
  0xb3   : > { %v255_v5 = vrot.slane %v251_v57, 7  ;;  %v300_v8 = vrot.slane %v296_v58, 7  ;;  %v526_v45 = vstv %s1388_s13  ;;  %v804_v41 = vstv %s1478_s26  ;;  %s1568_s26 = sld [smem:[#allocation2 + $0x59]] }
  0xb4   : > { %v806_v43 = vstv %s1486_s0  ;;  %v1552_v57 = vadd.f32 %v443_v13, %v441_v3  ;;  %v450_v58 = vstv %s1397_s12  ;;  %s1672_s12 = sld [smem:[#allocation2 + $0x21]] }
  0xb5   : > { %v256_v31 = vsel %vm240_vm2, %v253_v17, %v255_v5  ;;  %v301_v2 = vsel %vm240_vm2, %v298_v18, %v300_v8  ;;  %v569_v8 = vmul.f32 %v568_v51, %v1495_v35  ;;  %v1572_v18 = vadd.f32 %v595_v49, %v593_v22  ;;  %s2165_s0 = sld [smem:[#allocation23_spill]] }
  0xb6   : > { %v1542_v34 = vmul.f32 %v256_v31, %v226_v21  ;;  %v1559_v21 = vmul.f32 %v1535_v32, %v301_v2  ;;  %v781_v31 = vmul.f32 %v780_v52, %v1495_v35  ;;  %v805_v2 = vmul.f32 %v804_v41, %v1459_v14  ;;  %s1974_s13 = sld [smem:[#allocation2 + $0x18]] }
  0xb7   : > { %v807_v51 = vmul.f32 %v806_v43, %v1461_v15  ;;  %v705_v5 = vmul.f32 %v704_v56, %v1495_v35  ;;  %v1615_v56 = vld [vmem:[%s2060_s2 + $0x4] ss:$8 sm:$0x3]  ;;  %v730_v52 = vstv %s1579_s8  ;;  %s1966_s8 = sld [smem:[#allocation2 + $0x48]] }
  0xb8   : > { %v495_v50 = vmul.f32 %v494_v53, %v1542_v34  ;;  %v419_v22 = vmul.f32 %v418_v55, %v1542_v34  ;;  %v571_v41 = vmul.f32 %v570_v62, %v1542_v34  ;;  %v1606_v55 = vmul.f32 %v508_v54, %v1559_v21 }
  0xb9   : > { %v1570_v3 = vpop.permute.xlu1 %278  ;;  %v330_v13 = vpop.permute.xlu0 %329  ;;  %v783_v54 = vmul.f32 %v782_v6, %v1542_v34 }
  0xba   : > { %v337_v16 = vsel %vm333_vm5, %v1386_v40, %v330_v13  ;;  %v334_v53 = vsel %vm333_vm5, %v330_v13, %v1386_v40  ;;  %v1622_v40 = vmul.f32 %v432_v61, %v1559_v21  ;;  %v1629_v13 = vadd.f32 %v495_v50, %v493_v19 }
  0xbb   : > { %v339_v49 = vrot.slane %v337_v16, 7  ;;  %v1631_v62 = vadd.f32 %v419_v22, %v417_v44  ;;  %v1639_v61 = vadd.f32 %v571_v41, %v569_v8  ;;  %v728_v19 = vstv %s1556_s18  ;;  %s1678_s18 = sld [smem:[#allocation2 + $0x5a]]  ;;  %v361_v41 = vpop.permute.xlu2 %360 }
  0xbc   : > { %v1656_v50 = vmul.f32 %v796_v10, %v1559_v21  ;;  %v1664_v6 = vadd.f32 %v783_v54, %v781_v31  ;;  %v736_v22 = vstv %s1590_s27  ;;  %s2164_s27 = sld [smem:[#allocation34_spill]] }
  0xbd   : > { %v340_v43 = vsel %vm240_vm2, %v334_v53, %v339_v49  ;;  %v707_v49 = vmul.f32 %v706_v11, %v1542_v34  ;;  %v1644_v53 = vmul.f32 %v584_v1, %v1559_v21  ;;  %v1658_v11 = vadd.f32 %v807_v51, %v805_v2 }
  0xbe   : > { %v1651_v44 = vmul.f32 %v1615_v56, %v340_v43  ;;  %v1669_v43 = vmul.f32 %v720_v25, %v1559_v21  ;;  %v729_v51 = vmul.f32 %v728_v19, %v1459_v14  ;;  %v731_v19 = vmul.f32 %v730_v52, %v1461_v15 }
  0xbf   : > { %v1680_v31 = vadd.f32 %v707_v49, %v705_v5 }
  0xc0   : > { %v1692_v49 = vmul.f32 %v524_v20, %v1651_v44  ;;  %v1701_v17 = vmul.f32 %v448_v23, %v1651_v44  ;;  %v1713_v52 = vmul.f32 %v600_v24, %v1651_v44  ;;  %v1731_v24 = vadd.f32 %v731_v19, %v729_v51 }
  0xc1   : > { %v305_v8 = vpop.permute.xlu1 %304  ;;  %v276_v1 = vpop.permute.xlu0 %275  ;;  %v830_v51 = vstv %s1678_s18  ;;  %s1949_s18 = sld [smem:[#allocation2 + $0x61]] }
  0xc2   : > { %v309_v10 = vsel %vm295_vm4, %v1481_v26, %v305_v8  ;;  %v280_v2 = vsel %vm266_vm1, %v1570_v3, %v276_v1  ;;  %v311_v16 = vsel %vm295_vm4, %v305_v8, %v1481_v26  ;;  %v282_v5 = vsel %vm266_vm1, %v276_v1, %v1570_v3 }
  0xc3   : > { %v313_v25 = vrot.slane %v309_v10, 7  ;;  %v284_v54 = vrot.slane %v280_v2, 7 }
  0xc5   : > { %v314_v10 = vsel %vm240_vm2, %v311_v16, %v313_v25  ;;  %v285_v2 = vsel %vm240_vm2, %v282_v5, %v284_v54  ;;  %v1734_v25 = vmul.f32 %v736_v22, %v1651_v44 }
  0xc6   : > { %v1704_v26 = vmul.f32 %v1535_v32, %v314_v10  ;;  %v1707_v20 = vmul.f32 %v1381_v38, %v285_v2  ;;  %v1721_v32 = vmul.f32 %v812_v30, %v1651_v44 }
  0xc8   : > { %v503_v38 = vmul.f32 %v502_v27, %v1707_v20  ;;  %v427_v1 = vmul.f32 %v426_v29, %v1707_v20  ;;  %v579_v30 = vmul.f32 %v578_v37, %v1707_v20  ;;  %v791_v10 = vmul.f32 %v790_v46, %v1707_v20 }
  0xc9   : > { %v359_v54 = vpop.permute.xlu1 %358  ;;  %v346_v5 = vpop.permute.xlu0 %345  ;;  %v744_v27 = vstv %s1672_s12  ;;  %v511_v22 = vmul.f32 %v510_v28, %v1704_v26  ;;  %v435_v37 = vmul.f32 %v434_v33, %v1704_v26  ;;  %v587_v36 = vmul.f32 %v586_v39, %v1704_v26  ;;  %s1098_s12 = sld [smem:[#allocation2 + $0x4c]] }
  0xca   : > { %v366_v23 = vsel %vm362_vm6, %v361_v41, %v359_v54  ;;  %v350_v29 = vsel %vm333_vm5, %v346_v5, %v1561_v4  ;;  %v504_v16 = vadd.f32 %v503_v38, %v1421_v59  ;;  %v347_v46 = vsel %vm333_vm5, %v1561_v4, %v346_v5  ;;  %v1765_v59 = vpop.permute.xlu2 %387 }
  0xcb   : > { %v368_v19 = vrot.slane %v366_v23, 7  ;;  %v352_v8 = vrot.slane %v350_v29, 7  ;;  %v428_v2 = vadd.f32 %v427_v1, %v1424_v60  ;;  %v580_v3 = vadd.f32 %v579_v30, %v1431_v63 }
  0xcc   : > { %v505_v33 = vadd.f32 %v504_v16, %v1629_v13  ;;  %v792_v4 = vadd.f32 %v791_v10, %v1444_v7  ;;  %v799_v60 = vmul.f32 %v798_v47, %v1704_v26  ;;  %v363_v63 = vsel %vm362_vm6, %v359_v54, %v361_v41  ;;  %v1039_v13 = vld [vmem:[%s2060_s2 + $0x5] ss:$8 sm:$0x3] }
  0xcd   : > { %v353_v28 = vsel %vm240_vm2, %v347_v46, %v352_v8  ;;  %v429_v23 = vadd.f32 %v428_v2, %v1631_v62  ;;  %v581_v8 = vadd.f32 %v580_v3, %v1639_v61  ;;  %v369_v16 = vsel %vm240_vm2, %v363_v63, %v368_v19 }
  0xce   : > { %v1774_v39 = vmul.f32 %v1615_v56, %v353_v28  ;;  %v512_v7 = vadd.f32 %v511_v22, %v1606_v55  ;;  %v436_v47 = vadd.f32 %v435_v37, %v1622_v40  ;;  %v746_v41 = vstv %s1723_s23  ;;  %s1219_s23 = smov 32  }
  0xcf   : > { %v588_v61 = vadd.f32 %v587_v36, %v1644_v53  ;;  %v1795_v3 = vmul.f32 %v858_v48, %v1542_v34  ;;  %v2166_v54 = vstv %s2164_s27  ;;  %v1801_v30 = vmul.f32 %v1039_v13, %v369_v16  ;;  %s1961_s27 = sld [smem:[#allocation2 + $0x47]] }
  0xd0   : > { %v527_v56 = vmul.f32 %v526_v45, %v1774_v39  ;;  %v451_v62 = vmul.f32 %v450_v58, %v1774_v39  ;;  %v513_v55 = vadd.f32 %v512_v7, %v505_v33  ;;  %v437_v40 = vadd.f32 %v436_v47, %v429_v23 }
  0xd1   : > { %v375_v38 = vpop.permute.xlu1 %374  ;;  %v373_v1 = vpop.permute.xlu0 %372  ;;  %v603_v5 = vmul.f32 %v2166_v54, %v1774_v39  ;;  %v793_v45 = vadd.f32 %v792_v4, %v1664_v6  ;;  %v589_v36 = vadd.f32 %v588_v61, %v581_v8  ;;  %v800_v48 = vadd.f32 %v799_v60, %v1656_v50 }
  0xd2   : > { %v379_v58 = vsel %vm362_vm6, %v375_v38, %v373_v1  ;;  %v528_v10 = vadd.f32 %v527_v56, %v1692_v49  ;;  %v452_v2 = vadd.f32 %v451_v62, %v1701_v17  ;;  %v2169_v29 = vstv %s1519_s28  ;;  %v404_v16 = vpop.permute.xlu2 %403  ;;  %s1841_s28 = sld [smem:[#allocation2 + $0x53]] }
  0xd3   : > { %v381_v53 = vrot.slane %v379_v58, 7  ;;  %v715_v22 = vmul.f32 %v2169_v29, %v1707_v20  ;;  %v376_v19 = vsel %vm362_vm6, %v373_v1, %v375_v38  ;;  %v604_v6 = vadd.f32 %v603_v5, %v1713_v52 }
  0xd4   : > { %v2171_v37 = vstv %s2165_s0  ;;  %v864_v50 = vstv %s1762_s10  ;;  %v521_v17 = vadd.f32 %v1516_v9, %v513_v55  ;;  %v445_v49 = vadd.f32 %v1552_v57, %v437_v40  ;;  %s1955_s10 = sld [smem:[#allocation2 + $0x17]] }
  0xd5   : > { %v815_v46 = vmul.f32 %v2171_v37, %v1774_v39  ;;  %v382_v28 = vsel %vm240_vm2, %v376_v19, %v381_v53  ;;  %v801_v33 = vadd.f32 %v800_v48, %v793_v45  ;;  %v2173_v60 = vstv %s2167_s25  ;;  %s1979_s0 = sld [smem:[#allocation2 + $0x49]] }
  0xd6   : > { %v1821_v4 = vmul.f32 %v1039_v13, %v382_v28  ;;  %v533_v52 = vmul.f32 %v2173_v60, %v1801_v30  ;;  %v2174_v63 = vstv %s2168_s20  ;;  %v597_v8 = vadd.f32 %v1572_v18, %v589_v36  ;;  %s1985_s25 = sld [smem:[#allocation2 + $0x19]]  ;;  %s1221_s20 = smov 16  }
  0xd7   : > { %v457_v23 = vmul.f32 %v2174_v63, %v1801_v30  ;;  %v529_v7 = vadd.f32 %v528_v10, %v521_v17  ;;  %v453_v47 = vadd.f32 %v452_v2, %v445_v49  ;;  %v2175_v9 = vstv %s2170_s14  ;;  %s1995_s14 = sld [smem:[#allocation2 + $0x4a]] }
  0xd8   : > { %v609_v57 = vmul.f32 %v2175_v9, %v1801_v30  ;;  %v716_v13 = vadd.f32 %v715_v22, %v1457_v12  ;;  %v2176_v56 = vstv %s2151_s21  ;;  %v605_v61 = vadd.f32 %v604_v6, %v597_v8  ;;  %s1853_s21 = sld [smem:[#allocation2 + $0x5c]] }
  0xd9   : > { %v535_v62 = vmul.f32 %v2176_v56, %v1821_v4  ;;  %v816_v38 = vadd.f32 %v815_v46, %v1721_v32  ;;  %v2177_v1 = vstv %s2172_s3  ;;  %v402_v55 = vpop.permute.xlu1 %401  ;;  %v390_v40 = vpop.permute.xlu0 %389  ;;  %v809_v54 = vadd.f32 %v1658_v11, %v801_v33  ;;  %s1222_s3 = smov 96  }
  0xda   : > { %v821_v18 = vmul.f32 %v2177_v1, %v1801_v30  ;;  %v2178_v5 = vstv %s1529_s29  ;;  %v2179_v12 = vstv %s1599_s4  ;;  %v745_v36 = vmul.f32 %v744_v27, %v1801_v30  ;;  %s1864_s29 = sld [smem:[#allocation2 + $0x2c]]  ;;  %v1040_v27 = vld [vmem:[%s2060_s2 + $0x6] ss:$8 sm:$0x3] }
  0xdb   : > { %v723_v45 = vmul.f32 %v2178_v5, %v1704_v26  ;;  %v739_v58 = vmul.f32 %v2179_v12, %v1774_v39  ;;  %v408_v32 = vsel %vm391_vm7, %v404_v16, %v402_v55  ;;  %v395_v48 = vsel %vm391_vm7, %v390_v40, %v1765_v59  ;;  %s1097_s4 = sld [smem:[#allocation2 + $0x1b]] }
  0xdc   : > { %v2180_v53 = vstv %s1470_s5  ;;  %v2181_v10 = vstv %s1500_s22  ;;  %v410_v29 = vrot.slane %v408_v32, 7  ;;  %v397_v22 = vrot.slane %v395_v48, 7  ;;  %s1874_s5 = sld [smem:[#allocation2 + $0x15]] }
  0xdd   : > { %v459_v11 = vmul.f32 %v2180_v53, %v1821_v4  ;;  %v611_v2 = vmul.f32 %v2181_v10, %v1821_v4  ;;  %v536_v19 = vadd.f32 %v535_v62, %v533_v52  ;;  %v717_v6 = vadd.f32 %v716_v13, %v1680_v31  ;;  %s1882_s22 = sld [smem:[#allocation2 + $0x16]] }
  0xde   : > { %v405_v37 = vsel %vm391_vm7, %v402_v55, %v404_v16  ;;  %v392_v46 = vsel %vm391_vm7, %v1765_v59, %v390_v40  ;;  %v817_v28 = vadd.f32 %v816_v38, %v809_v54  ;;  %v752_v17 = vstv %s1815_s24  ;;  %s1095_s24 = sld [smem:[#allocation2 + $0x1a]] }
  0xdf   : > { %v411_v49 = vsel %vm240_vm2, %v405_v37, %v410_v29  ;;  %v398_v33 = vsel %vm240_vm2, %v392_v46, %v397_v22  ;;  %v2182_v60 = vstv %s1568_s26  ;;  %v724_v52 = vadd.f32 %v723_v45, %v1669_v43  ;;  %s1894_s26 = sld [smem:[#allocation2 + $0x5d]] }
  0xe0   : > { %v823_v31 = vmul.f32 %v2182_v60, %v1821_v4  ;;  %v1884_v59 = vmul.f32 %v1040_v27, %v411_v49  ;;  %v1886_v63 = vmul.f32 %v1040_v27, %v398_v33  ;;  %v460_v8 = vadd.f32 %v459_v11, %v457_v23 }
  0xe1   : > { %v740_v16 = vadd.f32 %v739_v58, %v1734_v25  ;;  %v537_v9 = vadd.f32 %v536_v19, %v529_v7  ;;  %v612_v13 = vadd.f32 %v611_v2, %v609_v57  ;;  %v725_v56 = vadd.f32 %v724_v52, %v717_v6 }
  0xe2   : > { %v747_v43 = vmul.f32 %v746_v41, %v1821_v4  ;;  %v2183_v62 = vstv %s1539_s6  ;;  %v2184_v1 = vstv %s1545_s1  ;;  %v2185_v55 = vstv %s1608_s17  ;;  %s1922_s1 = sld [smem:[#allocation2 + $0x5e]] }
  0xe3   : > { %v541_v38 = vmul.f32 %v2183_v62, %v1886_v63  ;;  %v543_v23 = vmul.f32 %v2184_v1, %v1884_v59  ;;  %v465_v25 = vmul.f32 %v2185_v55, %v1886_v63  ;;  %v2186_v40 = vstv %s1624_s9  ;;  %s1925_s17 = sld [smem:[#allocation2 + $0x5f]] }
  0xe4   : > { %v467_v7 = vmul.f32 %v2186_v40, %v1884_v59  ;;  %v2187_v57 = vstv %s1634_s7  ;;  %v2188_v41 = vstv %s1647_s16  ;;  %v2189_v45 = vstv %s1661_s11  ;;  %s1928_s9 = sld [smem:[#allocation2 + $0x2f]] }
  0xe5   : > { %v617_v54 = vmul.f32 %v2187_v57, %v1886_v63  ;;  %v619_v5 = vmul.f32 %v2188_v41, %v1884_v59  ;;  %v829_v12 = vmul.f32 %v2189_v45, %v1886_v63  ;;  %v831_v58 = vmul.f32 %v830_v51, %v1884_v59  ;;  %s2190_s6 = sld [smem:[#allocation19_spill]] }
  0xe6   : > { %v544_v32 = vadd.f32 %v543_v23, %v541_v38  ;;  %v461_v48 = vadd.f32 %v460_v8, %v453_v47  ;;  %v468_v53 = vadd.f32 %v467_v7, %v465_v25  ;;  %v754_v11 = vstv %s1841_s28  ;;  %s1933_s7 = sld [smem:[#allocation2 + $0x60]]  ;;  %s1223_s28 = smov 112  }
  0xe7   : > { %v613_v10 = vadd.f32 %v612_v13, %v605_v61  ;;  %v824_v2 = vadd.f32 %v823_v31, %v821_v18  ;;  %v733_v27 = vadd.f32 %v1731_v24, %v725_v56  ;;  %v748_v29 = vadd.f32 %v747_v43, %v745_v36  ;;  %s1938_s16 = sld [smem:[#allocation2 + $0x30]] }
  0xe8   : > { %v1930_v22 = vadd.f32 %v544_v32, %v537_v9  ;;  %v469_v19 = vadd.f32 %v468_v53, %v461_v48  ;;  %v620_v51 = vadd.f32 %v619_v5, %v617_v54  ;;  %v866_v6 = vstv %s1853_s21  ;;  %s1944_s11 = sld [smem:[#allocation2 + $0x46]] }
  0xe9   : > { %v832_v47 = vadd.f32 %v831_v58, %v829_v12  ;;  %v753_v37 = vmul.f32 %v752_v17, %v1886_v63  ;;  %v755_v61 = vmul.f32 %v754_v11, %v1884_v59  ;;  %v867_v24 = vmul.f32 %v866_v6, %v1707_v20  ;;  %s1096_s21 = sld [smem:[#allocation2 + $0x4b]] }
  0xea   : > { %v549_v18 = vperm.slane %v1930_v22, 1  ;;  %v477_v36 = vperm.slane %v469_v19, 0  ;;  %v473_v46 = vperm.slane %v469_v19, 1  ;;  %v865_v49 = vmul.f32 %v864_v50, %v1393_v42 }
  0xeb   : > { %v825_v33 = vadd.f32 %v824_v2, %v817_v28  ;;  %v741_v60 = vadd.f32 %v740_v16, %v733_v27  ;;  %v2191_v17 = vstv %s2190_s6  ;;  %v652_v52 = vstv %s1882_s22 }
  0xec   : > { %v857_v31 = vmul.f32 %v2191_v17, %v1495_v35  ;;  %550 = vrot.lane.b32.xlu2 %v549_v18, %s1219_s23  ;;  %478 = vrot.lane.b32.xlu1 %v477_v36, %s1220_s19  ;;  %v621_v8 = vadd.f32 %v620_v51, %v613_v10  ;;  %v868_v9 = vadd.f32 %v867_v24, %v865_v49  ;;  %v872_v50 = vstv %s1864_s29  ;;  %s1224_s29 = smov 80  }
  0xed   : > { %v874_v13 = vstv %s1894_s26  ;;  %474 = vrot.lane.b32.xlu0 %v473_v46, %s1220_s19  ;;  %v1957_v28 = vadd.f32 %v832_v47, %v825_v33  ;;  %v749_v16 = vadd.f32 %v748_v29, %v741_v60  ;;  %v756_v62 = vadd.f32 %v755_v61, %v753_v37  ;;  %s2192_s19 = sld [smem:[#allocation6_spill]] }
  0xee   : > { %v860_v56 = vadd.f32 %v1795_v3, %v857_v31  ;;  %v875_v43 = vmul.f32 %v874_v13, %v1704_v26  ;;  %v873_v38 = vmul.f32 %v872_v50, %v1559_v21  ;;  %v880_v1 = vstv %s1908_s30 }
  0xef   : > { %v882_v23 = vstv %s1922_s1  ;;  %v881_v25 = vmul.f32 %v880_v1, %v1459_v14  ;;  %v888_v3 = vstv %s1889_s15  ;;  %v629_v7 = vperm.slane %v621_v8, 0 }
  0xf0   : > { %v869_v55 = vadd.f32 %v868_v9, %v860_v56  ;;  %v883_v40 = vmul.f32 %v882_v23, %v1461_v15  ;;  %v553_v57 = vperm.slane %v1930_v22, 0  ;;  %v890_v54 = vstv %s1925_s17 }
  0xf1   : > { %v896_v41 = vstv %s1928_s9  ;;  %v876_v5 = vadd.f32 %v875_v43, %v873_v38  ;;  %v891_v45 = vmul.f32 %v890_v54, %v1774_v39  ;;  %v898_v12 = vstv %s1933_s7 }
  0xf2   : > { %v904_v58 = vstv %s1938_s16  ;;  %v625_v32 = vperm.slane %v621_v8, 1  ;;  %v757_v48 = vadd.f32 %v756_v62, %v749_v16  ;;  %v889_v53 = vmul.f32 %v888_v3, %v1651_v44 }
  0xf3   : > { %v644_v11 = vstv %s1874_s5  ;;  %v877_v10 = vadd.f32 %v876_v5, %v869_v55  ;;  %v884_v2 = vadd.f32 %v883_v40, %v881_v25  ;;  %v897_v27 = vmul.f32 %v896_v41, %v1801_v30 }
  0xf4   : > { %v906_v29 = vstv %s1949_s18  ;;  %630 = vrot.lane.b32.xlu2 %v629_v7, %s1221_s20  ;;  %626 = vrot.lane.b32.xlu1 %v625_v32, %s1221_s20  ;;  %v899_v22 = vmul.f32 %v898_v12, %v1821_v4  ;;  %v905_v19 = vmul.f32 %v904_v58, %v1886_v63  ;;  %v646_v51 = vstv %s1944_s11 }
  0xf5   : > { %v660_v6 = vstv %s1955_s10  ;;  %554 = vrot.lane.b32.xlu0 %v553_v57, %s1219_s23  ;;  %v892_v47 = vadd.f32 %v891_v45, %v889_v53  ;;  %v645_v37 = vmul.f32 %v644_v11, %v1495_v35  ;;  %v647_v61 = vmul.f32 %v646_v51, %v1542_v34  ;;  %s2193_s10 = sshll.u32 %s2192_s19, 3 }
  0xf6   : > { %v654_v24 = vstv %s1961_s27  ;;  %v907_v18 = vmul.f32 %v906_v29, %v1884_v59  ;;  %v653_v36 = vmul.f32 %v652_v52, %v1393_v42  ;;  %v662_v49 = vstv %s1966_s8 }
  0xf7   : > { %v655_v46 = vmul.f32 %v654_v24, %v1707_v20  ;;  %v885_v33 = vadd.f32 %v884_v2, %v877_v10  ;;  %v648_v60 = vadd.f32 %v647_v61, %v645_v37  ;;  %v661_v17 = vmul.f32 %v660_v6, %v1559_v21 }
  0xf8   : > { %v663_v35 = vmul.f32 %v662_v49, %v1704_v26  ;;  %v837_v34 = vperm.slane %v1957_v28, 0  ;;  %v762_v31 = vperm.slane %v757_v48, 1  ;;  %v900_v8 = vadd.f32 %v899_v22, %v897_v27 }
  0xf9   : > { %v656_v9 = vadd.f32 %v655_v46, %v653_v36  ;;  %v893_v50 = vadd.f32 %v892_v47, %v885_v33  ;;  %v668_v16 = vstv %s1974_s13  ;;  %v670_v56 = vstv %s1979_s0  ;;  %s2194_s13 = sld [smem:[#allocation37_spill]] }
  0xfa   : > { %v664_v13 = vadd.f32 %v663_v35, %v661_v17  ;;  %v908_v42 = vadd.f32 %v907_v18, %v905_v19  ;;  %v669_v52 = vmul.f32 %v668_v16, %v1459_v14  ;;  %v671_v43 = vmul.f32 %v670_v56, %v1461_v15  ;;  %v1054_v18 = vld [vmem:[%s2060_s2 + $0x7] ss:$8 sm:$0x3]  ;;  %v1099_v16 = vld [vmem:[%s2060_s2 + $0x12] ss:$8 sm:$0x3] }
  0xfb   : > { %v657_v20 = vadd.f32 %v656_v9, %v648_v60  ;;  %v761_v62 = vperm.slane %v757_v48, 0  ;;  %v676_v21 = vstv %s1985_s25  ;;  %v901_v26 = vadd.f32 %v900_v8, %v893_v50 }
  0xfc   : > { %839 = vrot.lane.b32.xlu2 %v837_v34, %s1222_s3  ;;  %765 = vrot.lane.b32.xlu1 %v762_v31, %s1223_s28  ;;  %v672_v1 = vadd.f32 %v671_v43, %v669_v52  ;;  %v678_v23 = vstv %s1995_s14  ;;  %v677_v25 = vmul.f32 %v676_v21, %v1651_v44  ;;  %v838_v54 = vperm.slane %v1957_v28, 1  ;;  %v1084_v31 = vld [vmem:[%s2060_s2 + $0x11] ss:$8 sm:$0x3] }
  0xfd   : > { %v665_v38 = vadd.f32 %v664_v13, %v657_v20  ;;  %763 = vrot.lane.b32.xlu0 %v761_v62, %s1223_s28  ;;  %v909_v55 = vadd.f32 %v908_v42, %v901_v26  ;;  %v679_v14 = vmul.f32 %v678_v23, %v1774_v39  ;;  %v684_v41 = vstv %s1095_s24  ;;  %v1114_v42 = vld [vmem:[%s2060_s2 + $0x13] ss:$8 sm:$0x3] }
  0xfe   : > { %v686_v5 = vstv %s1096_s21  ;;  %v685_v45 = vmul.f32 %v684_v41, %v1801_v30  ;;  %v692_v58 = vstv %s1097_s4  ;;  %v694_v32 = vstv %s1098_s12 }
  0xff   : > { %v673_v40 = vadd.f32 %v672_v1, %v665_v38  ;;  %v680_v15 = vadd.f32 %v679_v14, %v677_v25  ;;  %v914_v3 = vperm.slane %v909_v55, 1  ;;  %v913_v7 = vperm.slane %v909_v55, 0  ;;  %v1129_v25 = vld [vmem:[%s2060_s2 + $0x14] ss:$8 sm:$0x3]  ;;  %s184_s0 = scalar_lea.vmem %s2194_s13, %s2193_s10 }
 0x100   : > { %v687_v44 = vmul.f32 %v686_v5, %v1821_v4  ;;  %v693_v48 = vmul.f32 %v692_v58, %v1886_v63  ;;  %v695_v28 = vmul.f32 %v694_v32, %v1884_v59  ;;  %v1069_v59 = vld [vmem:[%s2060_s2 + $0x10] ss:$8 sm:$0x3] }
 0x101   : > { %v681_v57 = vadd.f32 %v680_v15, %v673_v40 }
 0x102   : > { %v688_v39 = vadd.f32 %v687_v44, %v685_v45  ;;  %v696_v53 = vadd.f32 %v695_v28, %v693_v48 }
 0x104   : > { %917 = vrot.lane.b32.xlu2 %v914_v3, %s1224_s29  ;;  %915 = vrot.lane.b32.xlu1 %v913_v7, %s1224_s29  ;;  %v689_v12 = vadd.f32 %v688_v39, %v681_v57  ;;  %v1144_v7 = vld [vmem:[%s2060_s2 + $0x15] ss:$8 sm:$0x3] }
 0x105   : > { %841 = vrot.lane.b32.xlu0 %v838_v54, %s1222_s3 }
 0x106   : > { %v697_v11 = vadd.f32 %v696_v53, %v689_v12 }
 0x108   : > { %v700_v38 = vmul.f32 %v1099_v16, %v697_v11 }
 0x146   : > { %v551_v10 = vpop.permute.xlu2 %550 }
 0x14e   : > { %v631_v29 = vpop.permute.xlu2 %630 }
 0x156   : > { %v840_v61 = vpop.permute.xlu2 %839 }
 0x15e   : > { %v479_v2 = vpop.permute.xlu1 %478  ;;  %v918_v52 = vpop.permute.xlu2 %917 }
 0x15f   : > { %v475_v27 = vpop.permute.xlu0 %474 }
 0x160   : > { %v481_v22 = vsel %vm480_vm8, %v479_v2, %v475_v27  ;;  %v483_v24 = vsel %vm480_vm8, %v475_v27, %v479_v2 }
 0x161   : > { %v485_v51 = vrot.slane %v481_v22, 7 }
 0x163   : > { %v486_v36 = vsel %vm240_vm2, %v483_v24, %v485_v51 }
 0x164   : > { %v488_v17 = vmul.f32 %v1054_v18, %v486_v36 }
 0x166   : > { %v627_v30 = vpop.permute.xlu1 %626 }
 0x167   : > { %v555_v4 = vpop.permute.xlu0 %554  ;;  %v633_v47 = vsel %vm632_vm10, %v631_v29, %v627_v30  ;;  %v635_v35 = vsel %vm632_vm10, %v627_v30, %v631_v29 }
 0x168   : > { %v557_v19 = vsel %vm556_vm9, %v555_v4, %v551_v10  ;;  %v559_v63 = vsel %vm556_vm9, %v551_v10, %v555_v4  ;;  %v637_v46 = vrot.slane %v633_v47, 7 }
 0x169   : > { %v561_v6 = vrot.slane %v557_v19, 7 }
 0x16a   : > { %v638_v8 = vsel %vm240_vm2, %v635_v35, %v637_v46 }
 0x16b   : > { %v562_v37 = vsel %vm240_vm2, %v559_v63, %v561_v6  ;;  %v640_v13 = vmul.f32 %v1084_v31, %v638_v8 }
 0x16c   : > { %v564_v49 = vmul.f32 %v1069_v59, %v562_v37 }
 0x16e   : > { %v766_v33 = vpop.permute.xlu1 %765  ;;  %v565_v50 = vadd.f32 %v564_v49, %v488_v17 }
 0x16f   : > { %v764_v60 = vpop.permute.xlu0 %763 }
 0x170   : > { %v771_v34 = vsel %vm767_vm11, %v766_v33, %v764_v60  ;;  %v768_v56 = vsel %vm767_vm11, %v764_v60, %v766_v33  ;;  %v641_v43 = vadd.f32 %v640_v13, %v565_v50 }
 0x171   : > { %v773_v9 = vrot.slane %v771_v34, 7 }
 0x172   : > { %v701_v40 = vadd.f32 %v700_v38, %v641_v43 }
 0x173   : > { %v774_v20 = vsel %vm240_vm2, %v768_v56, %v773_v9 }
 0x174   : > { %v776_v1 = vmul.f32 %v1114_v42, %v774_v20 }
 0x176   : > { %v916_v62 = vpop.permute.xlu1 %915  ;;  %v777_v41 = vadd.f32 %v776_v1, %v701_v40 }
 0x177   : > { %v923_v21 = vsel %vm919_vm12, %v918_v52, %v916_v62  ;;  %v842_v26 = vpop.permute.xlu0 %841  ;;  %v920_v15 = vsel %vm919_vm12, %v916_v62, %v918_v52 }
 0x178   : > { %v925_v23 = vrot.slane %v923_v21, 7  ;;  %v847_v55 = vsel %vm843_vm13, %v842_v26, %v840_v61  ;;  %v844_v3 = vsel %vm843_vm13, %v840_v61, %v842_v26 }
 0x179   : > { %v849_v14 = vrot.slane %v847_v55, 7 }
 0x17a   : > { %v926_v57 = vsel %vm240_vm2, %v920_v15, %v925_v23 }
 0x17b   : > { %v850_v54 = vsel %vm240_vm2, %v844_v3, %v849_v14  ;;  %v928_v45 = vmul.f32 %v1144_v7, %v926_v57 }
 0x17c   : > { %v852_v5 = vmul.f32 %v1129_v25, %v850_v54 }
 0x17e   : > { %v853_v44 = vadd.f32 %v852_v5, %v777_v41 }
 0x180   : > { %v929_v39 = vadd.f32 %v928_v45, %v853_v44 }
 0x182   : > { %v1145_v12 = vmul.f32 -1.442695, %v929_v39 }
 0x184   : > { %1181 = vpow2.f32 %v1145_v12 }
 0x18a   : > { %v1182_v58 = vpop.eup %1181 }
 0x18b   : > { %v933_v32 = vadd.f32 1.0, %v1182_v58 }
 0x18d   : > { %1183 = vrcp.f32 %v933_v32  ;;  %v945_v11 = vand.u32 2147483648, %v933_v32  ;;  %v943_v2 = vand.u32 2147483647, %v933_v32  ;;  %vm939_vm15 = vweird.f32 %v933_v32 }
 0x18f   : > { %v946_v29 = vor.u32 1.1754944e-38, %v945_v11  ;;  %vm944_vm2 = vcmp.eq.f32.partialorder %v943_v2, 8.507059e+37 }
 0x193   : > { %v1184_v48 = vpop.eup %1183 }
 0x194   : > { %v935_v28 = vmul.f32 %v1184_v48, %v933_v32  ;;  %vm940_vm14 = vweird.f32 %v1184_v48 }
 0x195   : > { %vm941_vm1 = vmor %vm939_vm15, %vm940_vm14 }
 0x196   : > { %v936_v53 = vsub.f32 1.0, %v935_v28 }
 0x198   : > { %v937_v10 = vmul.f32 %v1184_v48, %v936_v53 }
 0x19a   : > { %v938_v27 = vadd.f32 %v1184_v48, %v937_v10 }
 0x19c   : > { %v942_v22 = vsel %vm941_vm1, %v1184_v48, %v938_v27 }
 0x19d   : > { %v947_v30 = vsel %vm944_vm2, %v946_v29, %v942_v22 }
 0x19e   : > { %v951_v4 = vperm.slane %v947_v30, 1  ;;  %v950_v19 = vperm.slane %v947_v30, 0 }
 0x1a0   : > { %v952_v51 = vrot.slane %v951_v4, 4 }
 0x1a2   : > { %v953_v6 = vsel %vm192_vm0, %v950_v19, %v952_v51 }
 0x1a3   : > { %v955_v47 = vmul.f32 %v953_v6, %v1264_v0 }
 0x1a5   : > { %956 = vst [vmem:[%s184_s0] sm:$0xff] %v955_v47 }
 0x1a6 PF: > { %s2195_s25 = sld [smem:[#allocation5_spill]] }
 0x1ac   : > { %s14_s12 = sadd.s32 1, %s2195_s25  }
 0x1ad   : > { %p11_p7 = scmp.ge.s32.totalorder %s14_s12, 4  }
 0x1af   :  { %13 = sbr.rel (!%p11_p7) target bundleno = 5 (0x5), region = 80 }
 0x1b4   :  { %978 = vsyncpa [#allocation3], 1 }
 0x1b5   :  { %980 = vsyncpa [#allocation3 + $0x1], 1 }

</bundles_post_ra>
